<compile_context>
chip_gen: v6e
topology: v6e:2x2x1
jax: 0.10.0
libtpu: 0.0.40
codegen_flags: <defaults>
</compile_context>

<pallas_src>
import functools

import jax
import jax.numpy as jnp
from jax import lax
from jax.experimental import pallas as pl
from jax.experimental.pallas import tpu as pltpu

# Deterministic "parameters" of the two sub-kernels (synthetic init).
LENGTHSCALE = 1.0   # RBF lengthscale
RBF_VAR = 1.0       # RBF output variance
LIN_VAR = 0.5       # Linear kernel variance

_RBF_EXP_SCALE = -0.5 / (LENGTHSCALE * LENGTHSCALE)   # -1/(2*ls^2), negative
_XY_COEFF = -2.0 * _RBF_EXP_SCALE                     # +1/ls^2


def _round_up(x, m):
    return ((x + m - 1) // m) * m


def _pick_tile(size, cap, align):
    """Tile size (multiple of `align`, <= cap) with bounded padding.

    If the aligned size fits in one tile, use it directly. Otherwise pick the
    number of tiles needed at `cap` and split evenly, so total padding is at
    most (num_tiles * align) instead of up to a whole extra tile.
    """
    aligned = _round_up(size, align)
    if aligned <= cap:
        return aligned
    n_tiles = -(-aligned // cap)
    return _round_up(-(-aligned // n_tiles), align)


def _sum_kernel_body(x1_ref, x2_ref, x1sq_ref, x2sq_ref, o_ref, *, dot_precision):
    # x1_ref:   (tm, D)  tile of x1 (native dtype)
    # x2_ref:   (tn, D)  tile of x2 (native dtype)
    # x1sq_ref: (tm, 1)  _RBF_EXP_SCALE * ||x1_i||^2  (f32, hoisted to wrapper)
    # x2sq_ref: (1, tn)  _RBF_EXP_SCALE * ||x2_j||^2  (f32, hoisted to wrapper)
    # o_ref:    (tm, tn) output covariance tile

    # Cross inner products on the MXU, contracting the last dim of both
    # operands (no in-kernel transpose): (tm, D) x (tn, D) -> (tm, tn) f32.
    xy = lax.dot_general(
        x1_ref[...], x2_ref[...],
        dimension_numbers=(((1,), (1,)), ((), ())),
        preferred_element_type=jnp.float32,
        precision=dot_precision,
    )

    # RBF exponent: s*||a||^2 + s*||b||^2 + (-2s)*<a,b>, with s < 0.
    # min(arg, 0) is the scaled equivalent of max(sqdist, 0).
    arg = x1sq_ref[...] + x2sq_ref[...]
    if _XY_COEFF == 1.0:          # folded at trace time (ls == 1)
        arg = arg + xy
    else:
        arg = arg + _XY_COEFF * xy
    arg = jnp.minimum(arg, 0.0)

    rbf = jnp.exp(arg)            # EUP
    if RBF_VAR != 1.0:            # folded at trace time
        rbf = RBF_VAR * rbf
    o_ref[...] = (rbf + LIN_VAR * xy).astype(o_ref.dtype)


def sum_kernel(x1, x2, *, tm=512, tn=1024):
    """Compute kernel1(x1, x2) + kernel2(x1, x2) as an (N, M) f32 matrix."""
    N, D = x1.shape
    M, D2 = x2.shape
    assert D == D2, "feature dims must match"

    # Pad-aware tile selection (sublane/lane alignment: 8 / 128).
    tm_eff = _pick_tile(N, tm, 8)
    tn_eff = _pick_tile(M, tn, 128)

    # v7x has 2 TensorCores: for non-trivial problems make sure the 'parallel'
    # grid has at least 2 steps so both cores get work.
    n_i = -(-_round_up(N, 8) // tm_eff)
    n_j = -(-_round_up(M, 128) // tn_eff)
    if n_i * n_j == 1 and _round_up(N, 8) * _round_up(M, 128) >= 2 * 128 * 128:
        if tn_eff >= 256:
            tn_eff = _round_up(-(-tn_eff // 2), 128)
        elif tm_eff >= 16:
            tm_eff = _round_up(-(-tm_eff // 2), 8)

    # Pad N, M up to tile multiples in the wrapper; slice the result back.
    Np = _round_up(N, tm_eff)
    Mp = _round_up(M, tn_eff)
    x1p = x1 if Np == N else jnp.pad(x1, ((0, Np - N), (0, 0)))
    x2p = x2 if Mp == M else jnp.pad(x2, ((0, Mp - M), (0, 0)))

    # Hoisted + pre-scaled squared norms (computed once, outside the grid loop).
    x1f = x1p.astype(jnp.float32)
    x2f = x2p.astype(jnp.float32)
    x1_sq = (_RBF_EXP_SCALE * jnp.sum(x1f * x1f, axis=-1)).reshape(Np, 1)
    x2_sq = (_RBF_EXP_SCALE * jnp.sum(x2f * x2f, axis=-1)).reshape(1, Mp)

    grid = (Np // tm_eff, Mp // tn_eff)

    # x1/x1_sq fetched once per row block; x2/x2_sq re-streamed per row block;
    # full output written once. ~2D flops (MXU) + ~8 VPU ops + 1 exp per elem.
    cost = pl.CostEstimate(
        flops=Np * Mp * (2 * D + 8),
        transcendentals=Np * Mp,
        bytes_accessed=4 * (Np * D + Np + grid[0] * (Mp * D + Mp) + Np * Mp),
    )

    # Highest MXU precision for f32 callers (negligible cost at small D, avoids
    # bf16-pass cancellation in ||a||^2+||b||^2-2ab); bf16 callers keep 1 pass.
    dot_precision = lax.Precision.HIGHEST if x1.dtype == jnp.float32 else None
    body = functools.partial(_sum_kernel_body, dot_precision=dot_precision)

    out = pl.pallas_call(
        body,
        out_shape=jax.ShapeDtypeStruct((Np, Mp), jnp.float32),
        grid_spec=pltpu.PrefetchScalarGridSpec(
            num_scalar_prefetch=0,
            grid=grid,
            in_specs=[
                pl.BlockSpec((tm_eff, D), lambda i, j: (i, 0)),   # x1 row tile
                pl.BlockSpec((tn_eff, D), lambda i, j: (j, 0)),   # x2 row tile
                pl.BlockSpec((tm_eff, 1), lambda i, j: (i, 0)),   # scaled |x1|^2
                pl.BlockSpec((1, tn_eff), lambda i, j: (0, j)),   # scaled |x2|^2
            ],
            out_specs=pl.BlockSpec((tm_eff, tn_eff), lambda i, j: (i, j)),
        ),
        compiler_params=pltpu.CompilerParams(
            dimension_semantics=("parallel", "parallel"),
            vmem_limit_bytes=32 << 20,   # safe headroom even on v7x (64 MiB VMEM)
        ),
        cost_estimate=cost,
    )(x1p, x2p, x1_sq, x2_sq)

    if Np != N or Mp != M:
        out = out[:N, :M]
    return out


def _reference(x1, x2):
    x1 = x1.astype(jnp.float32)
    x2 = x2.astype(jnp.float32)
    xy = x1 @ x2.T
    sqdist = (
        jnp.sum(x1 * x1, -1)[:, None]
        + jnp.sum(x2 * x2, -1)[None, :]
        - 2.0 * xy
    )
    sqdist = jnp.maximum(sqdist, 0.0)
    rbf = RBF_VAR * jnp.exp(_RBF_EXP_SCALE * sqdist)
    lin = LIN_VAR * xy
    return rbf + lin


if __name__ == "__main__":
    key = jax.random.PRNGKey(0)
    k1, k2, k3, k4, k5, k6 = jax.random.split(key, 6)

    # Aligned shapes.
    N, M, D = 128, 128, 32
    x1 = jax.random.normal(k1, (N, D), dtype=jnp.float32)
    x2 = jax.random.normal(k2, (M, D), dtype=jnp.float32)
    out = sum_kernel(x1, x2)
    jax.block_until_ready(out)
    ref = _reference(x1, x2)
    assert out.shape == (N, M)
    assert jnp.allclose(out, ref, atol=1e-4, rtol=1e-4), "mismatch vs reference"

    # Unaligned shapes (exercises the padding path).
    N2, M2, D2 = 100, 200, 16
    y1 = jax.random.normal(k3, (N2, D2), dtype=jnp.float32)
    y2 = jax.random.normal(k4, (M2, D2), dtype=jnp.float32)
    out2 = sum_kernel(y1, y2)
    jax.block_until_ready(out2)
    ref2 = _reference(y1, y2)
    assert out2.shape == (N2, M2)
    assert jnp.allclose(out2, ref2, atol=1e-4, rtol=1e-4), "mismatch (padded)"

    # Multi-tile grid + pad-aware tile selection (exercises the 2-D grid path).
    N3, M3, D3 = 300, 1300, 32
    z1 = jax.random.normal(k5, (N3, D3), dtype=jnp.float32)
    z2 = jax.random.normal(k6, (M3, D3), dtype=jnp.float32)
    out3 = sum_kernel(z1, z2)
    jax.block_until_ready(out3)
    ref3 = _reference(z1, z2)
    assert out3.shape == (N3, M3)
    assert jnp.allclose(out3, ref3, atol=1e-4, rtol=1e-4), "mismatch (tiled)"

    print("KERNEL_OK")
</pallas_src>

<mosaic_0001>
module attributes {stable_mosaic.version = 11 : i64} {
  func.func @_sum_kernel_body(%arg0: i32, %arg1: i32, %arg2: memref<128x32xf32, #tpu.memory_space<vmem>>, %arg3: memref<128x32xf32, #tpu.memory_space<vmem>>, %arg4: memref<128x1xf32, #tpu.memory_space<vmem>>, %arg5: memref<1x128xf32, #tpu.memory_space<vmem>>, %arg6: memref<128x128xf32, #tpu.memory_space<vmem>>) attributes {dimension_semantics = [#tpu.dimension_semantics<parallel>, #tpu.dimension_semantics<parallel>], iteration_bounds = array<i64: 1, 1>, scalar_prefetch = 0 : i64, scratch_operands = 0 : i64, tpu.core_type = #tpu.core_type<tc>, window_params = [{transform_indices = @transform_0, window_bounds = array<i64: 128, 32>}, {transform_indices = @transform_1, window_bounds = array<i64: 128, 32>}, {transform_indices = @transform_2, window_bounds = array<i64: 128, 1>}, {transform_indices = @transform_3, window_bounds = array<i64: 1, 128>}, {transform_indices = @transform_4, window_bounds = array<i64: 128, 128>}]} {
    %c0 = arith.constant 0 : index
    %c0_0 = arith.constant 0 : index
    %0 = vector.load %arg2[%c0, %c0_0] : memref<128x32xf32, #tpu.memory_space<vmem>>, vector<128x32xf32>
    %c0_1 = arith.constant 0 : index
    %c0_2 = arith.constant 0 : index
    %1 = vector.load %arg3[%c0_1, %c0_2] : memref<128x32xf32, #tpu.memory_space<vmem>>, vector<128x32xf32>
    %cst = arith.constant dense<0.000000e+00> : vector<128x128xf32>
    %2 = tpu.matmul %0, %1, %cst {dimension_numbers = #tpu.dot_dimension_numbers<[1], [1], [0], [0], [0, 0, 1, 0], [], []>, precision = #tpu.contract_precision<fp32>} : vector<128x32xf32>, vector<128x32xf32>, vector<128x128xf32> -> vector<128x128xf32>
    %c0_3 = arith.constant 0 : index
    %c0_4 = arith.constant 0 : index
    %3 = vector.load %arg4[%c0_3, %c0_4] : memref<128x1xf32, #tpu.memory_space<vmem>>, vector<128x1xf32>
    %c0_5 = arith.constant 0 : index
    %c0_6 = arith.constant 0 : index
    %4 = vector.load %arg5[%c0_5, %c0_6] : memref<1x128xf32, #tpu.memory_space<vmem>>, vector<1x128xf32>
    %5 = vector.broadcast %3 : vector<128x1xf32> to vector<128x128xf32>
    %6 = vector.broadcast %4 : vector<1x128xf32> to vector<128x128xf32>
    %7 = arith.addf %5, %6 : vector<128x128xf32>
    %8 = arith.addf %7, %2 : vector<128x128xf32>
    %cst_7 = arith.constant 0.000000e+00 : f32
    %9 = vector.broadcast %cst_7 : f32 to vector<128x128xf32>
    %10 = arith.minimumf %8, %9 : vector<128x128xf32>
    %11 = math.exp %10 : vector<128x128xf32>
    %cst_8 = arith.constant 5.000000e-01 : f32
    %12 = vector.broadcast %cst_8 : f32 to vector<128x128xf32>
    %13 = arith.mulf %12, %2 : vector<128x128xf32>
    %14 = arith.addf %11, %13 : vector<128x128xf32>
    %c0_9 = arith.constant 0 : index
    %c0_10 = arith.constant 0 : index
    %15 = vector.load %arg6[%c0_9, %c0_10] : memref<128x128xf32, #tpu.memory_space<vmem>>, vector<128x128xf32>
    tpu.vector_store %arg6[%c0_9, %c0_10], %14 {strides = array<i32>} : memref<128x128xf32, #tpu.memory_space<vmem>>, vector<128x128xf32>,
    return
  }
  func.func @transform_0(%arg0: i32, %arg1: i32) -> (i32, i32) {
    %c0_i32 = arith.constant 0 : i32
    %c0_i32_0 = arith.constant 0 : i32
    return %arg0, %c0_i32 : i32, i32
  }
  func.func @transform_1(%arg0: i32, %arg1: i32) -> (i32, i32) {
    %c0_i32 = arith.constant 0 : i32
    %c0_i32_0 = arith.constant 0 : i32
    return %arg1, %c0_i32 : i32, i32
  }
  func.func @transform_2(%arg0: i32, %arg1: i32) -> (i32, i32) {
    %c0_i32 = arith.constant 0 : i32
    %c0_i32_0 = arith.constant 0 : i32
    return %arg0, %c0_i32 : i32, i32
  }
  func.func @transform_3(%arg0: i32, %arg1: i32) -> (i32, i32) {
    %c0_i32 = arith.constant 0 : i32
    %c0_i32_0 = arith.constant 0 : i32
    return %c0_i32, %arg1 : i32, i32
  }
  func.func @transform_4(%arg0: i32, %arg1: i32) -> (i32, i32) {
    %c0_i32 = arith.constant 0 : i32
    return %arg0, %arg1 : i32, i32
  }
}

</mosaic_0001>

<bundles_post_ra>
// kernel: tpu_custom_call.1
= control target key start
LH: loop header
LB: loop body
LE: loop exit
PB: predicated region body
PF: predicated region fallthrough
CT: control target
= control target key end

     0   :  { %vm50_vm0 = vcmask 261120   ;;  %s3333_s0 = inlined_call_operand.vmem [shape: f32[128,32], index: 0, kind: input, shape index: {}]   ;;  %s3334_s1 = inlined_call_operand.vmem [shape: f32[128,32], index: 1, kind: input, shape index: {}]   ;;  %s3335_s2 = inlined_call_operand.vmem [shape: f32[128,1], index: 2, kind: input, shape index: {}]   ;;  %s3336_s3 = inlined_call_operand.vmem [shape: f32[1,128], index: 3, kind: input, shape index: {}]   ;;  %s3337_s4 = inlined_call_operand.hbm [shape: f32[128,128], index: 4, kind: output, shape index: {}]  }
   0x1   :  { %v49_v0 = vld [vmem:[%s3334_s1 + $0x78] sm:$0xff]  ;;  %v48_v1 = vld [vmem:[%s3334_s1 + $0x70] sm:$0xff]  ;;  %v47_v2 = vld [vmem:[%s3334_s1 + $0x68] sm:$0xff] }
   0x2   :  { %v145_v3 = vsel %vm50_vm0, %v49_v0, 0  ;;  %v142_v4 = vsel %vm50_vm0, %v48_v1, 0  ;;  %v139_v5 = vsel %vm50_vm0, %v47_v2, 0  ;;  %v46_v6 = vld [vmem:[%s3334_s1 + $0x60] sm:$0xff]  ;;  %v45_v7 = vld [vmem:[%s3334_s1 + $0x58] sm:$0xff]  ;;  %v44_v12 = vld [vmem:[%s3334_s1 + $0x50] sm:$0xff] }
   0x3   :  { %v2316_v8 = vand.u32 4294901760, %v145_v3  ;;  %v2318_v9 = vand.u32 4294901760, %v142_v4  ;;  %v2320_v10 = vand.u32 4294901760, %v139_v5  ;;  %v136_v11 = vsel %vm50_vm0, %v46_v6, 0  ;;  %v43_v24 = vld [vmem:[%s3334_s1 + $0x48] sm:$0xff] }
   0x4   :  { %v2326_v13 = vand.u32 4294901760, %v136_v11  ;;  %v133_v14 = vsel %vm50_vm0, %v45_v7, 0  ;;  %v130_v19 = vsel %vm50_vm0, %v44_v12, 0  ;;  %v127_v28 = vsel %vm50_vm0, %v43_v24, 0 }
   0x5   :  { %1873 = vmatprep.subr.mxu0 %v2316_v8  ;;  %v2331_v15 = vsub.f32 %v145_v3, %v2316_v8  ;;  %v2334_v16 = vsub.f32 %v142_v4, %v2318_v9  ;;  %v2337_v17 = vsub.f32 %v139_v5, %v2320_v10  ;;  %v2340_v18 = vand.u32 4294901760, %v133_v14 }
   0x6   :  { %1874 = vmatpush3.xpose.msra.mxu0 %v2316_v8  ;;  %v2354_v23 = vsub.f32 %v136_v11, %v2326_v13  ;;  %v2364_v27 = vand.u32 4294901760, %v130_v19 }
   0x7   :  { %1875 = vmatprep.subr.mxu0 %v2318_v9  ;;  %v2345_v20 = vand.u32 4294901760, %v2331_v15  ;;  %v2348_v21 = vand.u32 4294901760, %v2334_v16  ;;  %v2351_v22 = vand.u32 4294901760, %v2337_v17  ;;  %v2368_v29 = vsub.f32 %v133_v14, %v2340_v18 }
   0x8   :  { %v2374_v33 = vand.u32 4294901760, %v2354_v23 }
   0x9   :  { %3390 = vst [vmem:[#allocation5_spill] sm:$0xff] %v2345_v20  ;;  %3391 = vst [vmem:[#allocation6_spill] sm:$0xff] %v2348_v21  ;;  %v392_v25 = vsub.f32 %v2331_v15, %v2345_v20  ;;  %v399_v26 = vsub.f32 %v2334_v16, %v2348_v21  ;;  %v406_v32 = vsub.f32 %v2337_v17, %v2351_v22 }
   0xa   :  { %3392 = vst [vmem:[#allocation7_spill] sm:$0xff] %v2351_v22  ;;  %1876 = vmatpush3.xpose.msra.mxu0 %v2318_v9  ;;  %3393 = vst [vmem:[#allocation8_spill] sm:$0xff] %v2374_v33 }
   0xb   :  { %1877 = vmatprep.subr.mxu0 %v2320_v10  ;;  %v393_v30 = vand.u32 4294901760, %v392_v25  ;;  %v400_v31 = vand.u32 4294901760, %v399_v26 }
   0xc   :  { %9 = vsyncpa [#allocation3], 0  ;;  %v42_v34 = vld [vmem:[%s3334_s1 + $0x40] sm:$0xff]  ;;  %v2380_v35 = vand.u32 4294901760, %v127_v28  ;;  %v2383_v36 = vsub.f32 %v130_v19, %v2364_v27  ;;  %v407_v37 = vand.u32 4294901760, %v406_v32  ;;  %v413_v38 = vsub.f32 %v2354_v23, %v2374_v33  ;;  %v41_v41 = vld [vmem:[%s3334_s1 + $0x38] sm:$0xff] }
   0xd   :  { %1929 = vmatprep.subr.mxu1 %v393_v30  ;;  %v2389_v39 = vand.u32 4294901760, %v2368_v29  ;;  %v124_v40 = vsel %vm50_vm0, %v42_v34, 0  ;;  %v121_v47 = vsel %vm50_vm0, %v41_v41, 0  ;;  %v18_v48 = vld [vmem:[%s3333_s0] sm:$0xff]  ;;  %v40_v49 = vld [vmem:[%s3334_s1 + $0x30] sm:$0xff]  ;;  %v39_v57 = vld [vmem:[%s3334_s1 + $0x28] sm:$0xff] }
   0xe   :  { %1878 = vmatpush3.xpose.msra.mxu0 %v2320_v10  ;;  %1930 = vmatpush3.xpose.msra.mxu1 %v393_v30  ;;  %v2397_v42 = vand.u32 4294901760, %v2383_v36  ;;  %v2400_v43 = vsub.f32 %v127_v28, %v2380_v35  ;;  %v414_v44 = vand.u32 4294901760, %v413_v38  ;;  %v2405_v46 = vand.u32 4294901760, %v124_v40  ;;  %v38_v2 = vld [vmem:[%s3334_s1 + $0x20] sm:$0xff]  ;;  %v37_v19 = vld [vmem:[%s3334_s1 + $0x18] sm:$0xff]  ;;  %v36_v34 = vld [vmem:[%s3334_s1 + $0x10] sm:$0xff] }
   0xf   :  { %1879 = vmatprep.subr.mxu0 %v2326_v13  ;;  %1931 = vmatprep.subr.mxu1 %v400_v31  ;;  %3394 = vst [vmem:[#allocation9_spill] sm:$0xff] %v2389_v39  ;;  %v420_v45 = vsub.f32 %v2368_v29, %v2389_v39  ;;  %v2417_v51 = vand.u32 4294901760, %v121_v47  ;;  %v52_v53 = vsel %vm50_vm0, %v18_v48, 0  ;;  %v118_v55 = vsel %vm50_vm0, %v40_v49, 0 }
  0x10   :  { %3395 = vst [vmem:[#allocation10_spill] sm:$0xff] %v2397_v42  ;;  %v427_v50 = vsub.f32 %v2383_v36, %v2397_v42  ;;  %v2420_v52 = vand.u32 4294901760, %v2400_v43  ;;  %v2426_v56 = vsub.f32 %v124_v40, %v2405_v46  ;;  %v2431_v58 = vand.u32 4294901760, %v52_v53 }
  0x11   :  { %v421_v54 = vand.u32 4294901760, %v420_v45  ;;  %v2438_v61 = vand.u32 4294901760, %v118_v55  ;;  %v115_v62 = vsel %vm50_vm0, %v39_v57, 0  ;;  %v2448_v1 = vsub.f32 %v121_v47, %v2417_v51  ;;  %v35_v47 = vld [vmem:[%s3334_s1 + $0x8] sm:$0xff] }
  0x12   :  { %1880 = vmatpush3.xpose.msra.mxu0 %v2326_v13  ;;  %1932 = vmatpush3.xpose.msra.mxu1 %v400_v31  ;;  %3396 = vst [vmem:[#allocation11_spill] sm:$0xff] %v2420_v52  ;;  %3397 = vst [vmem:[#allocation12_spill] sm:$0xff] %v2431_v58  ;;  %v2434_v59 = vsub.f32 %v52_v53, %v2431_v58  ;;  %v428_v60 = vand.u32 4294901760, %v427_v50  ;;  %v434_v63 = vsub.f32 %v2400_v43, %v2420_v52  ;;  %v19_v57 = vld [vmem:[%s3333_s0 + $0x8] sm:$0xff] }
  0x13   :  { %1881 = vmatprep.subr.mxu0 %v2340_v18  ;;  %1933 = vmatprep.subr.mxu1 %v407_v37  ;;  %v2445_v0 = vand.u32 4294901760, %v2426_v56  ;;  %v2458_v5 = vand.u32 4294901760, %v115_v62  ;;  %v112_v6 = vsel %vm50_vm0, %v38_v2, 0  ;;  %v2462_v7 = vsub.f32 %v118_v55, %v2438_v61  ;;  %v20_v2 = vld [vmem:[%s3333_s0 + $0x10] sm:$0xff] }
  0x14   :  { %1961 = vmatprep.mubr.f32.mxu1 %v2431_v58  ;;  %v3338_v3 = vand.u32 4294901760, %v2434_v59  ;;  %v435_v11 = vand.u32 4294901760, %v434_v63  ;;  %v2468_v14 = vand.u32 4294901760, %v2448_v1  ;;  %v2474_v25 = vand.u32 4294901760, %v112_v6 }
  0x15   :  { %3398 = vst [vmem:[#allocation13_spill] sm:$0xff] %v2445_v0  ;;  %v441_v12 = vsub.f32 %v2426_v56, %v2445_v0  ;;  %v109_v26 = vsel %vm50_vm0, %v37_v19, 0  ;;  %v2481_v31 = vand.u32 4294901760, %v2462_v7  ;;  %v2484_v32 = vsub.f32 %v115_v62, %v2458_v5  ;;  %v21_v19 = vld [vmem:[%s3333_s0 + $0x18] sm:$0xff] }
  0x16   :  { %1882 = vmatpush3.xpose.msra.mxu0 %v2340_v18  ;;  %1934 = vmatpush3.xpose.msra.mxu1 %v407_v37  ;;  %v231_v4 = vsub.f32 %v2434_v59, %v3338_v3  ;;  %3399 = vst [vmem:[#allocation14_spill] sm:$0xff] %v2468_v14  ;;  %v448_v30 = vsub.f32 %v2448_v1, %v2468_v14  ;;  %v2490_v37 = vand.u32 4294901760, %v109_v26  ;;  %v106_v38 = vsel %vm50_vm0, %v36_v34, 0 }
  0x17   :  { %1883 = vmatprep.subr.mxu0 %v2364_v27  ;;  %1935 = vmatprep.subr.mxu1 %v414_v44  ;;  %v442_v28 = vand.u32 4294901760, %v441_v12  ;;  %3400 = vst [vmem:[#allocation15_spill] sm:$0xff] %v2481_v31  ;;  %v455_v41 = vsub.f32 %v2462_v7, %v2481_v31  ;;  %v2500_v45 = vsub.f32 %v112_v6, %v2474_v25  ;;  %v2506_v48 = vand.u32 4294901760, %v106_v38 }
  0x18   :  { %v232_v24 = vand.u32 4294901760, %v231_v4  ;;  %v449_v40 = vand.u32 4294901760, %v448_v30  ;;  %v103_v49 = vsel %vm50_vm0, %v35_v47, 0  ;;  %v2516_v55 = vsub.f32 %v109_v26, %v2490_v37  ;;  %v22_v30 = vld [vmem:[%s3333_s0 + $0x20] sm:$0xff] }
  0x19   :  { %v456_v50 = vand.u32 4294901760, %v455_v41  ;;  %v2525_v62 = vand.u32 4294901760, %v103_v49  ;;  %v55_v63 = vsel %vm50_vm0, %v19_v57, 0  ;;  %v2538_v12 = vsub.f32 %v106_v38, %v2506_v48 }
  0x1a   :  { %1884 = vmatpush3.xpose.msra.mxu0 %v2364_v27  ;;  %1936 = vmatpush3.xpose.msra.mxu1 %v414_v44  ;;  %v2497_v44 = vand.u32 4294901760, %v2484_v32  ;;  %v2544_v26 = vand.u32 4294901760, %v55_v63  ;;  %v61_v38 = vsel %vm50_vm0, %v21_v19, 0  ;;  %v64_v57 = vsel %vm50_vm0, %v22_v30, 0  ;;  %v25_v30 = vld [vmem:[%s3333_s0 + $0x38] sm:$0xff] }
  0x1b   :  { %1885 = vmatprep.subr.mxu0 %v2380_v35  ;;  %1937 = vmatprep.subr.mxu1 %v421_v54  ;;  %3403 = vst [vmem:[#allocation18_spill] sm:$0xff] %v2525_v62  ;;  %v2552_v34 = vsub.f32 %v103_v49, %v2525_v62 }
  0x1c   :  { %1905 = vmatprep.mubr.f32.mxu0 %v232_v24  ;;  %3401 = vst [vmem:[#allocation16_spill] sm:$0xff] %v2497_v44  ;;  %v462_v53 = vsub.f32 %v2484_v32, %v2497_v44 }
  0x1d   :  { %v2580_v3 = vand.u32 4294901760, %v2552_v34 }
  0x1e   :  { %1886 = vmatpush3.xpose.msra.mxu0 %v2380_v35  ;;  %1938 = vmatpush3.xpose.msra.mxu1 %v421_v54  ;;  %v2513_v54 = vand.u32 4294901760, %v2500_v45  ;;  %v463_v4 = vand.u32 4294901760, %v462_v53 }
  0x1f   :  { %1887 = vmatprep.subr.mxu0 %v2405_v46  ;;  %1939 = vmatprep.subr.mxu1 %v428_v60  ;;  %3408 = vst [vmem:[#allocation23_spill] sm:$0xff] %v2580_v3 }
  0x20   :  { %3402 = vst [vmem:[#allocation17_spill] sm:$0xff] %v2513_v54  ;;  %v469_v6 = vsub.f32 %v2500_v45, %v2513_v54  ;;  %v2591_v54 = vand.u32 4294901760, %v64_v57 }
  0x22   :  { %1888 = vmatpush3.xpose.msra.mxu0 %v2405_v46  ;;  %1940 = vmatpush3.xpose.msra.mxu1 %v428_v60  ;;  %v34_v60 = vld [vmem:[%s3334_s1] sm:$0xff]  ;;  %v470_v41 = vand.u32 4294901760, %v469_v6  ;;  %v24_v6 = vld [vmem:[%s3333_s0 + $0x30] sm:$0xff] }
  0x23   :  { %1889 = vmatprep.subr.mxu0 %v2417_v51  ;;  %1941 = vmatprep.subr.mxu1 %v435_v11  ;;  %v100_v24 = vsel %vm50_vm0, %v34_v60, 0  ;;  %v2570_v60 = vsub.f32 %v55_v63, %v2544_v26  ;;  %v70_v31 = vsel %vm50_vm0, %v24_v6, 0 }
  0x24   :  { %v2561_v53 = vand.u32 4294901760, %v100_v24 }
  0x25   :  { %3407 = vst [vmem:[#allocation22_spill] sm:$0xff] %v2570_v60  ;;  %v3414_v52 = vand.u32 4294901760, %v2570_v60 }
  0x26   :  { %1890 = vmatpush3.xpose.msra.mxu0 %v2417_v51  ;;  %1942 = vmatpush3.xpose.msra.mxu1 %v435_v11  ;;  %v2535_v11 = vand.u32 4294901760, %v2516_v55  ;;  %3405 = vst [vmem:[#allocation20_spill] sm:$0xff] %v2561_v53 }
  0x27   :  { %1891 = vmatprep.subr.mxu0 %v2438_v61  ;;  %1943 = vmatprep.subr.mxu1 %v442_v28 }
  0x28   :  { %3404 = vst [vmem:[#allocation19_spill] sm:$0xff] %v2535_v11  ;;  %v476_v47 = vsub.f32 %v2516_v55, %v2535_v11  ;;  %v2589_v11 = vsub.f32 %v100_v24, %v2561_v53  ;;  %v26_v24 = vld [vmem:[%s3333_s0 + $0x40] sm:$0xff] }
  0x2a   :  { %1892 = vmatpush3.xpose.msra.mxu0 %v2438_v61  ;;  %1944 = vmatpush3.xpose.msra.mxu1 %v442_v28  ;;  %v58_v28 = vsel %vm50_vm0, %v20_v2, 0  ;;  %v2572_v2 = vand.u32 4294901760, %v61_v38  ;;  %v477_v63 = vand.u32 4294901760, %v476_v47  ;;  %v73_v47 = vsel %vm50_vm0, %v25_v30, 0 }
  0x2b   :  { %1893 = vmatprep.subr.mxu0 %v2458_v5  ;;  %1945 = vmatprep.subr.mxu1 %v449_v40  ;;  %v2566_v49 = vand.u32 4294901760, %v58_v28  ;;  %v2612_v58 = vand.u32 4294901760, %v2589_v11  ;;  %v2617_v30 = vand.u32 4294901760, %v70_v31  ;;  %v2626_v0 = vand.u32 4294901760, %v73_v47 }
  0x2c   :  { %v2601_v14 = vsub.f32 %v61_v38, %v2572_v2  ;;  %v2615_v38 = vsub.f32 %v64_v57, %v2591_v54  ;;  %v241_v57 = vsub.f32 %v2570_v60, %v3414_v52 }
  0x2d   :  { %3411 = vst [vmem:[#allocation26_spill] sm:$0xff] %v2612_v58  ;;  %v2643_v42 = vsub.f32 %v70_v31, %v2617_v30  ;;  %v2655_v21 = vsub.f32 %v73_v47, %v2626_v0 }
  0x2e   :  { %1894 = vmatpush3.xpose.msra.mxu0 %v2458_v5  ;;  %1946 = vmatpush3.xpose.msra.mxu1 %v449_v40  ;;  %v23_v40 = vld [vmem:[%s3333_s0 + $0x28] sm:$0xff]  ;;  %3410 = vst [vmem:[#allocation25_spill] sm:$0xff] %v2601_v14  ;;  %3412 = vst [vmem:[#allocation27_spill] sm:$0xff] %v2615_v38  ;;  %v3417_v52 = vand.u32 4294901760, %v2601_v14 }
  0x2f   :  { %1895 = vmatprep.subr.mxu0 %v2474_v25  ;;  %1947 = vmatprep.subr.mxu1 %v456_v50  ;;  %v67_v19 = vsel %vm50_vm0, %v23_v40, 0  ;;  %3415 = vst [vmem:[#allocation29_spill] sm:$0xff] %v2643_v42 }
  0x30   :  { %v2596_v44 = vand.u32 4294901760, %v67_v19  ;;  %v261_v31 = vsub.f32 %v2601_v14, %v3417_v52 }
  0x32   :  { %1896 = vmatpush3.xpose.msra.mxu0 %v2474_v25  ;;  %1948 = vmatpush3.xpose.msra.mxu1 %v456_v50  ;;  %v2564_v50 = vand.u32 4294901760, %v2538_v12 }
  0x33   :  { %1897 = vmatprep.subr.mxu0 %v2490_v37  ;;  %1949 = vmatprep.subr.mxu1 %v463_v4 }
  0x34   :  { %3406 = vst [vmem:[#allocation21_spill] sm:$0xff] %v2564_v50  ;;  %v483_v40 = vsub.f32 %v2538_v12, %v2564_v50  ;;  %v27_v50 = vld [vmem:[%s3333_s0 + $0x48] sm:$0xff] }
  0x35   :  { %v79_v33 = vsel %vm50_vm0, %v27_v50, 0  ;;  %v29_v50 = vld [vmem:[%s3333_s0 + $0x58] sm:$0xff] }
  0x36   :  { %1898 = vmatpush3.xpose.msra.mxu0 %v2490_v37  ;;  %1950 = vmatpush3.xpose.msra.mxu1 %v463_v4  ;;  %v2594_v4 = vsub.f32 %v58_v28, %v2566_v49  ;;  %v490_v28 = vsub.f32 %v2552_v34, %v2580_v3  ;;  %v484_v6 = vand.u32 4294901760, %v483_v40  ;;  %v2624_v3 = vsub.f32 %v67_v19, %v2596_v44  ;;  %v28_v19 = vld [vmem:[%s3333_s0 + $0x50] sm:$0xff] }
  0x37   :  { %1899 = vmatprep.subr.mxu0 %v2506_v48  ;;  %1951 = vmatprep.subr.mxu1 %v470_v41  ;;  %v76_v40 = vsel %vm50_vm0, %v26_v24, 0  ;;  %v497_v24 = vsub.f32 %v2589_v11, %v2612_v58  ;;  %v242_v58 = vand.u32 4294901760, %v241_v57  ;;  %v2660_v60 = vand.u32 4294901760, %v79_v33 }
  0x38   :  { %3409 = vst [vmem:[#allocation24_spill] sm:$0xff] %v2594_v4  ;;  %3413 = vst [vmem:[#allocation28_spill] sm:$0xff] %v2624_v3  ;;  %v491_v39 = vand.u32 4294901760, %v490_v28  ;;  %v82_v20 = vsel %vm50_vm0, %v28_v19, 0  ;;  %v3418_v57 = vand.u32 4294901760, %v2615_v38  ;;  %v3419_v14 = vand.u32 4294901760, %v2624_v3 }
  0x39   :  { %v498_v47 = vand.u32 4294901760, %v497_v24  ;;  %v2686_v22 = vsub.f32 %v79_v33, %v2660_v60  ;;  %v3420_v33 = vand.u32 4294901760, %v2643_v42 }
  0x3a   :  { %1900 = vmatpush3.xpose.msra.mxu0 %v2506_v48  ;;  %1952 = vmatpush3.xpose.msra.mxu1 %v470_v41  ;;  %v2645_v41 = vand.u32 4294901760, %v76_v40  ;;  %v271_v52 = vsub.f32 %v2615_v38, %v3418_v57  ;;  %v262_v57 = vand.u32 4294901760, %v261_v31 }
  0x3b   :  { %1901 = vmatprep.subr.mxu0 %v2525_v62  ;;  %1953 = vmatprep.subr.mxu1 %v477_v63  ;;  %v291_v31 = vsub.f32 %v2643_v42, %v3420_v33 }
  0x3c   :  { %v2674_v19 = vsub.f32 %v76_v40, %v2645_v41 }
  0x3e   :  { %1902 = vmatpush3.xpose.msra.mxu0 %v2525_v62  ;;  %1954 = vmatpush3.xpose.msra.mxu1 %v477_v63  ;;  %v3416_v63 = vand.u32 4294901760, %v2594_v4  ;;  %v85_v62 = vsel %vm50_vm0, %v29_v50, 0 }
  0x3f   :  { %1903 = vmatprep.subr.mxu0 %v2561_v53  ;;  %1955 = vmatprep.subr.mxu1 %v484_v6  ;;  %v2688_v40 = vand.u32 4294901760, %v85_v62 }
  0x40   :  { %v251_v28 = vsub.f32 %v2594_v4, %v3416_v63  ;;  %v30_v63 = vld [vmem:[%s3333_s0 + $0x60] sm:$0xff]  ;;  %v2683_v4 = vand.u32 4294901760, %v82_v20 }
  0x41   :  { %v88_v38 = vsel %vm50_vm0, %v30_v63, 0  ;;  %v3421_v63 = vand.u32 4294901760, %v2655_v21  ;;  %v2714_v24 = vsub.f32 %v85_v62, %v2688_v40 }
  0x42   :  { %1904 = vmatpush3.xpose.msra.mxu0 %v2561_v53  ;;  %1956 = vmatpush3.xpose.msra.mxu1 %v484_v6  ;;  %v31_v6 = vld [vmem:[%s3333_s0 + $0x68] sm:$0xff]  ;;  %v252_v50 = vand.u32 4294901760, %v251_v28  ;;  %v281_v53 = vsub.f32 %v2624_v3, %v3419_v14  ;;  %v32_v14 = vld [vmem:[%s3333_s0 + $0x70] sm:$0xff]  ;;  %v2708_v3 = vsub.f32 %v82_v20, %v2683_v4  ;;  %v292_v20 = vand.u32 4294901760, %v291_v31 }
  0x43   :  { %1957 = vmatprep.subr.mxu1 %v491_v39  ;;  %1985 = vmatprep.subr.mxu0 %v2331_v15  ;;  %v91_v28 = vsel %vm50_vm0, %v31_v6, 0  ;;  %v301_v6 = vsub.f32 %v2655_v21, %v3421_v63 }
  0x44   :  { %v2716_v42 = vand.u32 4294901760, %v91_v28  ;;  %v330_v33 = vand.u32 4294901760, %v2708_v3 }
  0x45   :  { %1906 = vmatmul.mubr.f32.vlgmr.msra.gmra.mxu0 %v242_v58  ;;  %v272_v58 = vand.u32 4294901760, %v271_v52  ;;  %v2710_v52 = vand.u32 4294901760, %v88_v38  ;;  %v302_v62 = vand.u32 4294901760, %v301_v6 }
  0x46   :  { %1958 = vmatpush3.xpose.msra.mxu1 %v491_v39  ;;  %1986 = vmatpush3.xpose.msra.mxu0 %v2331_v15  ;;  %v33_v15 = vld [vmem:[%s3333_s0 + $0x78] sm:$0xff]  ;;  %v282_v39 = vand.u32 4294901760, %v281_v53 }
  0x47   :  { %1959 = vmatprep.subr.mxu1 %v498_v47  ;;  %1987 = vmatprep.subr.mxu0 %v2334_v16  ;;  %v97_v53 = vsel %vm50_vm0, %v33_v15, 0  ;;  %v3389_v15 = vand.u32 4294901760, %v2714_v24 }
  0x48   :  { %1908 = vmatprep.mubr.f32.mxu0 %v252_v50  ;;  %v94_v50 = vsel %vm50_vm0, %v32_v14, 0  ;;  %v2728_v14 = vsub.f32 %v88_v38, %v2710_v52 }
  0x49   :  { %1909 = vmatmul.mubr.f32.gmra.mxu0 %v262_v57  ;;  %v3422_v57 = vand.u32 4294901760, %v2674_v19 }
  0x4a   :  { %1960 = vmatpush3.xpose.msra.mxu1 %v498_v47  ;;  %1988 = vmatpush3.xpose.msra.mxu0 %v2334_v16  ;;  %v2730_v47 = vand.u32 4294901760, %v94_v50  ;;  %v3423_v16 = vand.u32 4294901760, %v2686_v22 }
  0x4b   :  { %1989 = vmatprep.subr.mxu0 %v2337_v17  ;;  %2041 = vmatprep.subr.mxu1 %v2316_v8  ;;  %v311_v63 = vsub.f32 %v2674_v19, %v3422_v57  ;;  %v2738_v57 = vsub.f32 %v91_v28, %v2716_v42  ;;  %v350_v28 = vand.u32 4294901760, %v2728_v14 }
  0x4c   :  { %1911 = vmatprep.mubr.f32.mxu0 %v272_v58  ;;  %v321_v31 = vsub.f32 %v2686_v22, %v3423_v16  ;;  %v2740_v58 = vand.u32 4294901760, %v97_v53  ;;  %v2752_v6 = vsub.f32 %v94_v50, %v2730_v47  ;;  %v341_v16 = vsub.f32 %v2714_v24, %v3389_v15 }
  0x4d   :  { %1962 = vmatmul.mubr.f32.vlgmr.msra.gmra.mxu1 %v2544_v26  ;;  %1912 = vmatmul.mubr.f32.gmra.mxu0 %v282_v39  ;;  %v312_v38 = vand.u32 4294901760, %v311_v63  ;;  %v331_v39 = vsub.f32 %v2708_v3, %v330_v33 }
  0x4e   :  { %1990 = vmatpush3.xpose.msra.mxu0 %v2337_v17  ;;  %2042 = vmatpush3.xpose.msra.mxu1 %v2316_v8  ;;  %v322_v17 = vand.u32 4294901760, %v321_v31  ;;  %v2760_v63 = vsub.f32 %v97_v53, %v2740_v58  ;;  %v370_v31 = vand.u32 4294901760, %v2752_v6 }
  0x4f   :  { %1991 = vmatprep.subr.mxu0 %v2354_v23  ;;  %2043 = vmatprep.subr.mxu1 %v2318_v9  ;;  %v332_v50 = vand.u32 4294901760, %v331_v39 }
  0x50   :  { %1964 = vmatprep.mubr.f32.mxu1 %v2566_v49  ;;  %1914 = vmatprep.mubr.f32.mxu0 %v292_v20  ;;  %v360_v20 = vand.u32 4294901760, %v2738_v57  ;;  %v380_v15 = vand.u32 4294901760, %v2760_v63  ;;  %v371_v39 = vsub.f32 %v2752_v6, %v370_v31 }
  0x51   :  { %1965 = vmatmul.mubr.f32.gmra.mxu1 %v2572_v2  ;;  %1915 = vmatmul.mubr.f32.gmra.mxu0 %v302_v62  ;;  %v351_v62 = vsub.f32 %v2728_v14, %v350_v28 }
  0x52   :  { %1992 = vmatpush3.xpose.msra.mxu0 %v2354_v23  ;;  %2044 = vmatpush3.xpose.msra.mxu1 %v2318_v9  ;;  %v342_v23 = vand.u32 4294901760, %v341_v16  ;;  %v361_v53 = vsub.f32 %v2738_v57, %v360_v20  ;;  %v372_v16 = vand.u32 4294901760, %v371_v39  ;;  %v3427_v39 = vld [vmem:[#allocation22_spill] sm:$0xff] }
  0x53   :  { %1993 = vmatprep.subr.mxu0 %v2368_v29  ;;  %2045 = vmatprep.subr.mxu1 %v2320_v10 }
  0x54   :  { %1967 = vmatprep.mubr.f32.mxu1 %v2591_v54  ;;  %1917 = vmatprep.mubr.f32.mxu0 %v312_v38  ;;  %v352_v38 = vand.u32 4294901760, %v351_v62  ;;  %v1437_v62 = vld [vmem:[%s3335_s2 + $0x20] sm:$0xff] }
  0x55   :  { %1968 = vmatmul.mubr.f32.gmra.mxu1 %v2596_v44  ;;  %1918 = vmatmul.mubr.f32.gmra.mxu0 %v322_v17  ;;  %v362_v17 = vand.u32 4294901760, %v361_v53  ;;  %v1441_v53 = vld [vmem:[%s3335_s2 + $0x40] sm:$0xff] }
  0x56   :  { %1994 = vmatpush3.xpose.msra.mxu0 %v2368_v29  ;;  %2046 = vmatpush3.xpose.msra.mxu1 %v2320_v10  ;;  %v381_v29 = vsub.f32 %v2760_v63, %v380_v15 }
  0x57   :  { %1995 = vmatprep.subr.mxu0 %v2383_v36  ;;  %2047 = vmatprep.subr.mxu1 %v2326_v13 }
  0x58   :  { %1970 = vmatprep.mubr.f32.mxu1 %v2617_v30  ;;  %1920 = vmatprep.mubr.f32.mxu0 %v332_v50  ;;  %v382_v50 = vand.u32 4294901760, %v381_v29  ;;  %v3429_v29 = vld [vmem:[#allocation20_spill] sm:$0xff] }
  0x59   :  { %1971 = vmatmul.mubr.f32.gmra.mxu1 %v2626_v0  ;;  %1921 = vmatmul.mubr.f32.gmra.mxu0 %v342_v23  ;;  %v1439_v23 = vld [vmem:[%s3335_s2 + $0x30] sm:$0xff] }
  0x5a   :  { %1996 = vmatpush3.xpose.msra.mxu0 %v2383_v36  ;;  %2048 = vmatpush3.xpose.msra.mxu1 %v2326_v13  ;;  %v1435_v36 = vld [vmem:[%s3335_s2 + $0x10] sm:$0xff] }
  0x5b   :  { %1997 = vmatprep.subr.mxu0 %v2400_v43  ;;  %2049 = vmatprep.subr.mxu1 %v2340_v18 }
  0x5c   :  { %1973 = vmatprep.mubr.f32.mxu1 %v2645_v41  ;;  %1923 = vmatprep.mubr.f32.mxu0 %v352_v38  ;;  %v3426_v38 = vld [vmem:[#allocation5_spill] sm:$0xff] }
  0x5d   :  { %1974 = vmatmul.mubr.f32.gmra.mxu1 %v2660_v60  ;;  %1924 = vmatmul.mubr.f32.gmra.mxu0 %v362_v17  ;;  %v3428_v17 = vld [vmem:[#allocation24_spill] sm:$0xff] }
  0x5e   :  { %1998 = vmatpush3.xpose.msra.mxu0 %v2400_v43  ;;  %2050 = vmatpush3.xpose.msra.mxu1 %v2340_v18  ;;  %v3424_v43 = vand.u32 4294901760, %v2434_v59 }
  0x5f   :  { %1999 = vmatprep.subr.mxu0 %v2426_v56  ;;  %2051 = vmatprep.subr.mxu1 %v2364_v27 }
  0x60   :  { %1976 = vmatprep.mubr.f32.mxu1 %v2683_v4  ;;  %1926 = vmatprep.mubr.f32.mxu0 %v372_v16  ;;  %v3430_v16 = vld [vmem:[#allocation6_spill] sm:$0xff] }
  0x61   :  { %1977 = vmatmul.mubr.f32.gmra.mxu1 %v2688_v40  ;;  %1927 = vmatmul.mubr.f32.gmra.mxu0 %v382_v50  ;;  %v3431_v50 = vld [vmem:[#allocation25_spill] sm:$0xff] }
  0x62   :  { %2000 = vmatpush3.xpose.msra.mxu0 %v2426_v56  ;;  %2052 = vmatpush3.xpose.msra.mxu1 %v2364_v27  ;;  %v2269_v56 = vmov 0  }
  0x63   :  { %2001 = vmatprep.subr.mxu0 %v2448_v1  ;;  %2053 = vmatprep.subr.mxu1 %v2380_v35 }
  0x64   :  { %1979 = vmatprep.mubr.f32.mxu1 %v2710_v52  ;;  %2017 = vmatprep.mubr.f32.mxu0 %v2434_v59  ;;  %v1434_v59 = vld [vmem:[%s3335_s2 + $0x8] sm:$0xff] }
  0x65   :  { %1980 = vmatmul.mubr.f32.gmra.mxu1 %v2716_v42  ;;  %2214 = vset.pattern.permute.xlu1 %v2269_v56 }
  0x66   :  { %2002 = vmatpush3.xpose.msra.mxu0 %v2448_v1  ;;  %2054 = vmatpush3.xpose.msra.mxu1 %v2380_v35  ;;  %v1433_v1 = vld [vmem:[%s3335_s2] sm:$0xff] }
  0x67   :  { %2003 = vmatprep.subr.mxu0 %v2462_v7  ;;  %2055 = vmatprep.subr.mxu1 %v2405_v46 }
  0x68   :  { %1982 = vmatprep.mubr.f32.mxu1 %v2730_v47  ;;  %2213 = vset.pattern.permute.xlu0 %v2269_v56  ;;  %v3434_v56 = vld [vmem:[#allocation28_spill] sm:$0xff] }
  0x69   :  { %1983 = vmatmul.mubr.f32.gmra.mxu1 %v2740_v58  ;;  %1462 = vperm.xlu1 %2214, %v1435_v36   ;;  %v3432_v36 = vld [vmem:[#allocation27_spill] sm:$0xff] }
  0x6a   :  { %2004 = vmatpush3.xpose.msra.mxu0 %v2462_v7  ;;  %2056 = vmatpush3.xpose.msra.mxu1 %v2405_v46  ;;  %v1436_v7 = vld [vmem:[%s3335_s2 + $0x18] sm:$0xff] }
  0x6b   :  { %2005 = vmatprep.subr.mxu0 %v2484_v32  ;;  %2057 = vmatprep.subr.mxu1 %v2417_v51 }
  0x6c   :  { %2073 = vmatprep.mubr.f32.mxu1 %v3424_v43  ;;  %1452 = vperm.xlu0 %2213, %v1433_v1   ;;  %v3433_v43 = vld [vmem:[#allocation7_spill] sm:$0xff]  ;;  %v3435_v1 = vand.u32 4294901760, %v3427_v39 }
  0x6d   :  { %1467 = vperm.xlu1 %2214, %v1436_v7   ;;  %v3436_v7 = vld [vmem:[#allocation29_spill] sm:$0xff] }
  0x6e   :  { %2006 = vmatpush3.xpose.msra.mxu0 %v2484_v32  ;;  %2058 = vmatpush3.xpose.msra.mxu1 %v2417_v51  ;;  %v1438_v32 = vld [vmem:[%s3335_s2 + $0x28] sm:$0xff] }
  0x6f   :  { %2007 = vmatprep.subr.mxu0 %v2500_v45  ;;  %2059 = vmatprep.subr.mxu1 %v2438_v61 }
  0x70   :  { %1457 = vperm.xlu0 %2213, %v1434_v59   ;;  %v3437_v59 = vand.u32 4294901760, %v3428_v17 }
  0x71   :  { %1477 = vperm.xlu1 %2214, %v1438_v32   ;;  %v3438_v32 = vld [vmem:[#allocation8_spill] sm:$0xff] }
  0x72   :  { %2008 = vmatpush3.xpose.msra.mxu0 %v2500_v45  ;;  %2060 = vmatpush3.xpose.msra.mxu1 %v2438_v61  ;;  %v1440_v45 = vld [vmem:[%s3335_s2 + $0x38] sm:$0xff] }
  0x73   :  { %2009 = vmatprep.subr.mxu0 %v2516_v55  ;;  %2061 = vmatprep.subr.mxu1 %v2458_v5 }
  0x74   :  { %1472 = vperm.xlu0 %2213, %v1437_v62   ;;  %v3439_v62 = vand.u32 4294901760, %v3431_v50 }
  0x75   :  { %1487 = vperm.xlu1 %2214, %v1440_v45   ;;  %v3441_v45 = vld [vmem:[#allocation9_spill] sm:$0xff] }
  0x76   :  { %2010 = vmatpush3.xpose.msra.mxu0 %v2516_v55  ;;  %2062 = vmatpush3.xpose.msra.mxu1 %v2458_v5  ;;  %v1442_v55 = vld [vmem:[%s3335_s2 + $0x48] sm:$0xff] }
  0x77   :  { %2011 = vmatprep.subr.mxu0 %v2538_v12  ;;  %2063 = vmatprep.subr.mxu1 %v2474_v25 }
  0x78   :  { %1482 = vperm.xlu0 %2213, %v1439_v23   ;;  %v3442_v23 = vand.u32 4294901760, %v3434_v56 }
  0x79   :  { %1497 = vperm.xlu1 %2214, %v1442_v55   ;;  %v3444_v55 = vld [vmem:[#allocation10_spill] sm:$0xff] }
  0x7a   :  { %2012 = vmatpush3.xpose.msra.mxu0 %v2538_v12  ;;  %2064 = vmatpush3.xpose.msra.mxu1 %v2474_v25  ;;  %v3425_v12 = vld [vmem:[#allocation18_spill] sm:$0xff] }
  0x7b   :  { %2013 = vmatprep.subr.mxu0 %v2552_v34  ;;  %2065 = vmatprep.subr.mxu1 %v2490_v37 }
  0x7c   :  { %1492 = vperm.xlu0 %2213, %v1441_v53   ;;  %v3445_v53 = vand.u32 4294901760, %v2655_v21 }
  0x7e   :  { %2014 = vmatpush3.xpose.msra.mxu0 %v2552_v34  ;;  %2066 = vmatpush3.xpose.msra.mxu1 %v2490_v37  ;;  %v1444_v34 = vld [vmem:[%s3335_s2 + $0x58] sm:$0xff] }
  0x7f   :  { %2015 = vmatprep.subr.mxu0 %v2589_v11  ;;  %2067 = vmatprep.subr.mxu1 %v2506_v48 }
  0x80   :  { %1507 = vperm.xlu1 %2214, %v1444_v34  }
  0x82   :  { %2016 = vmatpush3.xpose.msra.mxu0 %v2589_v11  ;;  %2068 = vmatpush3.xpose.msra.mxu1 %v2506_v48  ;;  %v1443_v11 = vld [vmem:[%s3335_s2 + $0x50] sm:$0xff] }
  0x83   :  { %2069 = vmatprep.subr.mxu1 %v3425_v12  ;;  %2097 = vmatprep.subr.mxu0 %v3426_v38 }
  0x84   :  { %1502 = vperm.xlu0 %2213, %v1443_v11  }
  0x85   :  { %2018 = vmatmul.mubr.f32.vlgmr.msra.gmra.mxu0 %v3427_v39  ;;  %v3448_v39 = vand.u32 4294901760, %v2686_v22 }
  0x86   :  { %2070 = vmatpush3.xpose.msra.mxu1 %v3425_v12  ;;  %2098 = vmatpush3.xpose.msra.mxu0 %v3426_v38  ;;  %v3447_v38 = vld [vmem:[#allocation11_spill] sm:$0xff] }
  0x87   :  { %2020 = vmatprep.mubr.f32.mxu0 %v3428_v17  ;;  %2071 = vmatprep.subr.mxu1 %v3429_v29 }
  0x88   :  { %2099 = vmatprep.subr.mxu0 %v3430_v16 }
  0x89   :  { %2021 = vmatmul.mubr.f32.gmra.mxu0 %v3431_v50 }
  0x8a   :  { %2072 = vmatpush3.xpose.msra.mxu1 %v3429_v29  ;;  %2100 = vmatpush3.xpose.msra.mxu0 %v3430_v16 }
  0x8b   :  { %2023 = vmatprep.mubr.f32.mxu0 %v3432_v36  ;;  %2101 = vmatprep.subr.mxu0 %v3433_v43 }
  0x8c   :  { %2153 = vmatprep.subr.mxu1 %v2316_v8 }
  0x8d   :  { %2024 = vmatmul.mubr.f32.gmra.mxu0 %v3434_v56  ;;  %2074 = vmatmul.mubr.f32.vlgmr.msra.gmra.mxu1 %v3435_v1 }
  0x8e   :  { %2102 = vmatpush3.xpose.msra.mxu0 %v3433_v43  ;;  %2154 = vmatpush3.xpose.msra.mxu1 %v2316_v8  ;;  %v3440_v8 = vand.u32 4294901760, %v3432_v36 }
  0x8f   :  { %2026 = vmatprep.mubr.f32.mxu0 %v3436_v7  ;;  %2076 = vmatprep.mubr.f32.mxu1 %v3437_v59 }
  0x90   :  { %2103 = vmatprep.subr.mxu0 %v3438_v32  ;;  %2155 = vmatprep.subr.mxu1 %v2318_v9 }
  0x91   :  { %2027 = vmatmul.mubr.f32.gmra.mxu0 %v2655_v21  ;;  %2077 = vmatmul.mubr.f32.gmra.mxu1 %v3439_v62  ;;  %v3450_v21 = vand.u32 4294901760, %v2714_v24 }
  0x92   :  { %2104 = vmatpush3.xpose.msra.mxu0 %v3438_v32  ;;  %2156 = vmatpush3.xpose.msra.mxu1 %v2318_v9  ;;  %v3443_v9 = vand.u32 4294901760, %v3436_v7 }
  0x93   :  { %2029 = vmatprep.mubr.f32.mxu0 %v2674_v19  ;;  %2079 = vmatprep.mubr.f32.mxu1 %v3440_v8 }
  0x94   :  { %2105 = vmatprep.subr.mxu0 %v3441_v45  ;;  %2157 = vmatprep.subr.mxu1 %v2320_v10 }
  0x95   :  { %2030 = vmatmul.mubr.f32.gmra.mxu0 %v2686_v22  ;;  %2080 = vmatmul.mubr.f32.gmra.mxu1 %v3442_v23  ;;  %v3451_v22 = vld [vmem:[#allocation14_spill] sm:$0xff] }
  0x96   :  { %2106 = vmatpush3.xpose.msra.mxu0 %v3441_v45  ;;  %2158 = vmatpush3.xpose.msra.mxu1 %v2320_v10  ;;  %v3446_v10 = vand.u32 4294901760, %v2674_v19  ;;  %v1448_v19 = vld [vmem:[%s3335_s2 + $0x78] sm:$0xff] }
  0x97   :  { %2032 = vmatprep.mubr.f32.mxu0 %v2708_v3  ;;  %2082 = vmatprep.mubr.f32.mxu1 %v3443_v9  ;;  %v3452_v3 = vld [vmem:[#allocation12_spill] sm:$0xff] }
  0x98   :  { %2107 = vmatprep.subr.mxu0 %v3444_v55  ;;  %2159 = vmatprep.subr.mxu1 %v2326_v13 }
  0x99   :  { %2033 = vmatmul.mubr.f32.gmra.mxu0 %v2714_v24  ;;  %2083 = vmatmul.mubr.f32.gmra.mxu1 %v3445_v53  ;;  %v3453_v24 = vld [vmem:[#allocation15_spill] sm:$0xff] }
  0x9a   :  { %2108 = vmatpush3.xpose.msra.mxu0 %v3444_v55  ;;  %2160 = vmatpush3.xpose.msra.mxu1 %v2326_v13  ;;  %v3449_v13 = vld [vmem:[#allocation13_spill] sm:$0xff] }
  0x9b   :  { %2035 = vmatprep.mubr.f32.mxu0 %v2728_v14  ;;  %2085 = vmatprep.mubr.f32.mxu1 %v3446_v10  ;;  %v3455_v14 = vld [vmem:[#allocation17_spill] sm:$0xff] }
  0x9c   :  { %2109 = vmatprep.subr.mxu0 %v3447_v38  ;;  %2161 = vmatprep.subr.mxu1 %v2340_v18 }
  0x9d   :  { %2036 = vmatmul.mubr.f32.gmra.mxu0 %v2738_v57  ;;  %2086 = vmatmul.mubr.f32.gmra.mxu1 %v3448_v39 }
  0x9e   :  { %2110 = vmatpush3.xpose.msra.mxu0 %v3447_v38  ;;  %2162 = vmatpush3.xpose.msra.mxu1 %v2340_v18  ;;  %v1446_v18 = vld [vmem:[%s3335_s2 + $0x68] sm:$0xff] }
  0x9f   :  { %2038 = vmatprep.mubr.f32.mxu0 %v2752_v6  ;;  %2088 = vmatprep.mubr.f32.mxu1 %v330_v33  ;;  %v3454_v33 = vld [vmem:[#allocation16_spill] sm:$0xff] }
  0xa0   :  { %2111 = vmatprep.subr.mxu0 %v3449_v13  ;;  %2163 = vmatprep.subr.mxu1 %v2364_v27 }
  0xa1   :  { %2039 = vmatmul.mubr.f32.gmra.mxu0 %v2760_v63  ;;  %2089 = vmatmul.mubr.f32.gmra.mxu1 %v3450_v21 }
  0xa2   :  { %2112 = vmatpush3.xpose.msra.mxu0 %v3449_v13  ;;  %2164 = vmatpush3.xpose.msra.mxu1 %v2364_v27  ;;  %v1445_v27 = vld [vmem:[%s3335_s2 + $0x60] sm:$0xff] }
  0xa3   :  { %2091 = vmatprep.mubr.f32.mxu1 %v350_v28  ;;  %2113 = vmatprep.subr.mxu0 %v3451_v22 }
  0xa4   :  { %2165 = vmatprep.subr.mxu1 %v2380_v35  ;;  %2129 = vmatprep.mubr.f32.mxu0 %v3452_v3 }
  0xa5   :  { %2092 = vmatmul.mubr.f32.gmra.mxu1 %v360_v20  ;;  %1517 = vperm.xlu1 %2214, %v1446_v18  }
  0xa6   :  { %2114 = vmatpush3.xpose.msra.mxu0 %v3451_v22  ;;  %2166 = vmatpush3.xpose.msra.mxu1 %v2380_v35  ;;  %v1447_v35 = vld [vmem:[%s3335_s2 + $0x70] sm:$0xff] }
  0xa7   :  { %2094 = vmatprep.mubr.f32.mxu1 %v370_v31  ;;  %2115 = vmatprep.subr.mxu0 %v3453_v24 }
  0xa8   :  { %2167 = vmatprep.subr.mxu1 %v2405_v46  ;;  %1512 = vperm.xlu0 %2213, %v1445_v27  }
  0xa9   :  { %2095 = vmatmul.mubr.f32.gmra.mxu1 %v380_v15  ;;  %1527 = vperm.xlu1 %2214, %v1448_v19   ;;  %v3457_v15 = vld [vmem:[#allocation21_spill] sm:$0xff] }
  0xaa   :  { %2116 = vmatpush3.xpose.msra.mxu0 %v3453_v24  ;;  %2168 = vmatpush3.xpose.msra.mxu1 %v2405_v46  ;;  %v3456_v46 = vld [vmem:[#allocation19_spill] sm:$0xff] }
  0xab   :  { %2117 = vmatprep.subr.mxu0 %v3454_v33  ;;  %2169 = vmatprep.subr.mxu1 %v2417_v51 }
  0xac   :  { %2185 = vmatprep.mubr.f32.mxu1 %v3452_v3  ;;  %1522 = vperm.xlu0 %2213, %v1447_v35  }
  0xae   :  { %2118 = vmatpush3.xpose.msra.mxu0 %v3454_v33  ;;  %2170 = vmatpush3.xpose.msra.mxu1 %v2417_v51  ;;  %v3458_v51 = vld [vmem:[#allocation23_spill] sm:$0xff] }
  0xaf   :  { %2119 = vmatprep.subr.mxu0 %v3455_v14  ;;  %2171 = vmatprep.subr.mxu1 %v2438_v61 }
  0xb2   :  { %2120 = vmatpush3.xpose.msra.mxu0 %v3455_v14  ;;  %2172 = vmatpush3.xpose.msra.mxu1 %v2438_v61  ;;  %v3459_v61 = vld [vmem:[#allocation26_spill] sm:$0xff] }
  0xb3   :  { %2121 = vmatprep.subr.mxu0 %v3456_v46  ;;  %2173 = vmatprep.subr.mxu1 %v2458_v5 }
  0xb6   :  { %2122 = vmatpush3.xpose.msra.mxu0 %v3456_v46  ;;  %2174 = vmatpush3.xpose.msra.mxu1 %v2458_v5 }
  0xb7   :  { %2123 = vmatprep.subr.mxu0 %v3457_v15  ;;  %2175 = vmatprep.subr.mxu1 %v2474_v25 }
  0xba   :  { %2124 = vmatpush3.xpose.msra.mxu0 %v3457_v15  ;;  %2176 = vmatpush3.xpose.msra.mxu1 %v2474_v25 }
  0xbb   :  { %2125 = vmatprep.subr.mxu0 %v3458_v51  ;;  %2177 = vmatprep.subr.mxu1 %v2490_v37 }
  0xbe   :  { %2126 = vmatpush3.xpose.msra.mxu0 %v3458_v51  ;;  %2178 = vmatpush3.xpose.msra.mxu1 %v2490_v37 }
  0xbf   :  { %2127 = vmatprep.subr.mxu0 %v3459_v61  ;;  %2179 = vmatprep.subr.mxu1 %v2506_v48 }
  0xc2   :  { %2128 = vmatpush3.xpose.msra.mxu0 %v3459_v61  ;;  %2180 = vmatpush3.xpose.msra.mxu1 %v2506_v48 }
  0xc3   :  { %2181 = vmatprep.subr.mxu1 %v3425_v12 }
  0xc5   :  { %2130 = vmatmul.mubr.f32.vlgmr.msra.gmra.mxu0 %v2544_v26 }
  0xc6   :  { %2182 = vmatpush3.xpose.msra.mxu1 %v3425_v12  ;;  %2132 = vmatprep.mubr.f32.mxu0 %v2566_v49 }
  0xc7   :  { %2183 = vmatprep.subr.mxu1 %v3429_v29 }
  0xc9   :  { %2133 = vmatmul.mubr.f32.gmra.mxu0 %v2572_v2 }
  0xca   :  { %2184 = vmatpush3.xpose.msra.mxu1 %v3429_v29  ;;  %2135 = vmatprep.mubr.f32.mxu0 %v2591_v54 }
  0xcd   :  { %2136 = vmatmul.mubr.f32.gmra.mxu0 %v2596_v44  ;;  %2186 = vmatmul.mubr.f32.vlgmr.msra.gmra.mxu1 %v2544_v26 }
  0xce   :  { %2138 = vmatprep.mubr.f32.mxu0 %v2617_v30  ;;  %2188 = vmatprep.mubr.f32.mxu1 %v2566_v49 }
  0xd1   :  { %2139 = vmatmul.mubr.f32.gmra.mxu0 %v2626_v0  ;;  %2189 = vmatmul.mubr.f32.gmra.mxu1 %v2572_v2 }
  0xd2   :  { %2141 = vmatprep.mubr.f32.mxu0 %v2645_v41  ;;  %2191 = vmatprep.mubr.f32.mxu1 %v2591_v54 }
  0xd5   :  { %2142 = vmatmul.mubr.f32.gmra.mxu0 %v2660_v60  ;;  %2192 = vmatmul.mubr.f32.gmra.mxu1 %v2596_v44 }
  0xd6   :  { %2144 = vmatprep.mubr.f32.mxu0 %v2683_v4  ;;  %2194 = vmatprep.mubr.f32.mxu1 %v2617_v30 }
  0xd9   :  { %2145 = vmatmul.mubr.f32.gmra.mxu0 %v2688_v40  ;;  %2195 = vmatmul.mubr.f32.gmra.mxu1 %v2626_v0 }
  0xda   :  { %2147 = vmatprep.mubr.f32.mxu0 %v2710_v52  ;;  %2197 = vmatprep.mubr.f32.mxu1 %v2645_v41 }
  0xdd   :  { %2148 = vmatmul.mubr.f32.gmra.mxu0 %v2716_v42  ;;  %2198 = vmatmul.mubr.f32.gmra.mxu1 %v2660_v60 }
  0xde   :  { %2150 = vmatprep.mubr.f32.mxu0 %v2730_v47  ;;  %2200 = vmatprep.mubr.f32.mxu1 %v2683_v4 }
  0xe1   :  { %2151 = vmatmul.mubr.f32.gmra.mxu0 %v2740_v58  ;;  %2201 = vmatmul.mubr.f32.gmra.mxu1 %v2688_v40 }
  0xe2   :  { %2203 = vmatprep.mubr.f32.mxu1 %v2710_v52 }
  0xe4   :  { %v1463_v55 = vpop.permute.xlu1 %1462 }
  0xe5   :  { %2204 = vmatmul.mubr.f32.gmra.mxu1 %v2716_v42 }
  0xe6   :  { %2206 = vmatprep.mubr.f32.mxu1 %v2730_v47 }
  0xe7   :  { %v1453_v53 = vpop.permute.xlu0 %1452 }
  0xe8   :  { %v1468_v39 = vpop.permute.xlu1 %1467 }
  0xe9   :  { %2207 = vmatmul.mubr.f32.gmra.mxu1 %v2740_v58 }
  0xeb   :  { %v1458_v18 = vpop.permute.xlu0 %1457 }
  0xec   :  { %v1478_v27 = vpop.permute.xlu1 %1477 }
  0xef   :  { %v1473_v19 = vpop.permute.xlu0 %1472 }
  0xf0   :  { %v1488_v33 = vpop.permute.xlu1 %1487 }
  0xf3   :  { %v1483_v15 = vpop.permute.xlu0 %1482 }
 0x105   :  { %v3034_v0 = vpop.f32.mrf.mxu0 }
 0x107   :  { %v3036_v5 = vpop.f32.mrf.mxu0 }
 0x109   :  { %v3038_v25 = vpop.f32.mrf.mxu0 }
 0x10b   :  { %v3042_v44 = vpop.f32.mrf.mxu0 }
 0x10d   :  { %v3040_v37 = vpop.f32.mrf.mxu1  ;;  %v3046_v54 = vpop.f32.mrf.mxu0 }
 0x10f   :  { %v3044_v48 = vpop.f32.mrf.mxu1  ;;  %v3050_v42 = vpop.f32.mrf.mxu0 }
 0x111   :  { %v3048_v26 = vpop.f32.mrf.mxu1  ;;  %v3054_v60 = vpop.f32.mrf.mxu0 }
 0x113   :  { %v3052_v49 = vpop.f32.mrf.mxu1  ;;  %v3058_v4 = vpop.f32.mrf.mxu0 }
 0x115   :  { %v3056_v2 = vpop.f32.mrf.mxu1  ;;  %v3062_v41 = vpop.f32.mrf.mxu0 }
 0x117   :  { %v3060_v30 = vpop.f32.mrf.mxu1  ;;  %v3066_v52 = vpop.f32.mrf.mxu0 }
 0x119   :  { %v3064_v40 = vpop.f32.mrf.mxu1  ;;  %v3070_v57 = vpop.f32.mrf.mxu0 }
 0x11b   :  { %v3068_v47 = vpop.f32.mrf.mxu1  ;;  %v3074_v28 = vpop.f32.mrf.mxu0 }
 0x11d   :  { %v3072_v58 = vpop.f32.mrf.mxu1  ;;  %v3078_v20 = vpop.f32.mrf.mxu0 }
 0x11f   :  { %v3076_v6 = vpop.f32.mrf.mxu1  ;;  %v3082_v31 = vpop.f32.mrf.mxu0 }
 0x121   :  { %v3080_v63 = vpop.f32.mrf.mxu1  ;;  %v3086_v34 = vpop.f32.mrf.mxu0 }
 0x123   :  { %v3084_v12 = vpop.f32.mrf.mxu1  ;;  %v3090_v17 = vpop.f32.mrf.mxu0 }
 0x125   :  { %v3088_v11 = vpop.f32.mrf.mxu1 }
 0x127   :  { %v3092_v29 = vpop.f32.mrf.mxu1 }
 0x129   :  { %v3094_v50 = vpop.f32.mrf.mxu1 }
 0x12b   :  { %v3098_v43 = vpop.f32.mrf.mxu1 }
 0x145   :  { %v2019_v16 = vpop.f32.mrf.mxu0 }
 0x147   :  { %v3096_v36 = vpop.f32.mrf.mxu0 }
 0x149   :  { %v3100_v56 = vpop.f32.mrf.mxu0 }
 0x14b   :  { %v3104_v7 = vpop.f32.mrf.mxu0 }
 0x14d   :  { %v3102_v1 = vpop.f32.mrf.mxu1  ;;  %v3108_v32 = vpop.f32.mrf.mxu0 }
 0x14e   :  { %3460 = vst [vmem:[#allocation18_spill] sm:$0xff] %v3108_v32 }
 0x14f   :  { %v3106_v59 = vpop.f32.mrf.mxu1  ;;  %v3112_v8 = vpop.f32.mrf.mxu0 }
 0x150   :  { %3461 = vst [vmem:[#allocation5_spill] sm:$0xff] %v3112_v8 }
 0x151   :  { %v3110_v62 = vpop.f32.mrf.mxu1  ;;  %v3116_v23 = vpop.f32.mrf.mxu0 }
 0x152   :  { %3463 = vst [vmem:[#allocation24_spill] sm:$0xff] %v3116_v23 }
 0x153   :  { %v3114_v45 = vpop.f32.mrf.mxu1  ;;  %v3120_v10 = vpop.f32.mrf.mxu0 }
 0x154   :  { %3462 = vst [vmem:[#allocation22_spill] sm:$0xff] %v3114_v45  ;;  %3465 = vst [vmem:[#allocation6_spill] sm:$0xff] %v3120_v10 }
 0x155   :  { %v3118_v9 = vpop.f32.mrf.mxu1  ;;  %v3124_v13 = vpop.f32.mrf.mxu0 }
 0x156   :  { %3464 = vst [vmem:[#allocation20_spill] sm:$0xff] %v3118_v9  ;;  %3467 = vst [vmem:[#allocation27_spill] sm:$0xff] %v3124_v13 }
 0x157   :  { %v3122_v38 = vpop.f32.mrf.mxu1  ;;  %v3128_v22 = vpop.f32.mrf.mxu0 }
 0x158   :  { %3466 = vst [vmem:[#allocation25_spill] sm:$0xff] %v3122_v38  ;;  %3469 = vst [vmem:[#allocation28_spill] sm:$0xff] %v3128_v22  ;;  %v1493_v38 = vpop.permute.xlu0 %1492 }
 0x159   :  { %v3126_v21 = vpop.f32.mrf.mxu1  ;;  %v3132_v24 = vpop.f32.mrf.mxu0 }
 0x15a   :  { %3468 = vst [vmem:[#allocation7_spill] sm:$0xff] %v3126_v21  ;;  %3471 = vst [vmem:[#allocation8_spill] sm:$0xff] %v3132_v24  ;;  %v1498_v21 = vpop.permute.xlu1 %1497 }
 0x15b   :  { %v3130_v3 = vpop.f32.mrf.mxu1  ;;  %v3136_v14 = vpop.f32.mrf.mxu0 }
 0x15c   :  { %3470 = vst [vmem:[#allocation29_spill] sm:$0xff] %v3130_v3  ;;  %3473 = vst [vmem:[#allocation10_spill] sm:$0xff] %v3136_v14  ;;  %v1503_v13 = vpop.permute.xlu0 %1502 }
 0x15d   :  { %v3134_v35 = vpop.f32.mrf.mxu1  ;;  %v3140_v51 = vpop.f32.mrf.mxu0 }
 0x15e   :  { %3472 = vst [vmem:[#allocation9_spill] sm:$0xff] %v3134_v35  ;;  %3475 = vst [vmem:[#allocation13_spill] sm:$0xff] %v3140_v51  ;;  %v1508_v9 = vpop.permute.xlu1 %1507 }
 0x15f   :  { %v3138_v46 = vpop.f32.mrf.mxu1  ;;  %v3144_v22 = vpop.f32.mrf.mxu0 }
 0x160   :  { %3474 = vst [vmem:[#allocation11_spill] sm:$0xff] %v3138_v46  ;;  %3477 = vst [vmem:[#allocation12_spill] sm:$0xff] %v3144_v22 }
 0x161   :  { %v3142_v61 = vpop.f32.mrf.mxu1  ;;  %v3148_v24 = vpop.f32.mrf.mxu0 }
 0x162   :  { %3476 = vst [vmem:[#allocation14_spill] sm:$0xff] %v3142_v61  ;;  %3479 = vst [vmem:[#allocation16_spill] sm:$0xff] %v3148_v24  ;;  %v1680_v61 = vld [vmem:[%s3336_s3] ss:$0 sm:$0xff]  ;;  %v1518_v51 = vpop.permute.xlu1 %1517  ;;  %v542_v24 = vadd.f32 %v3040_v37, %v3034_v0  ;;  %v536_v0 = vadd.f32 %v3044_v48, %v3036_v5  ;;  %v560_v5 = vadd.f32 %v3060_v30, %v3050_v42  ;;  %s2270_s3 = smov [#allocation2]  }
 0x163   :  { %v3146_v3 = vpop.f32.mrf.mxu1  ;;  %v3152_v14 = vpop.f32.mrf.mxu0  ;;  %v3159_v10 = vadd.f32 %v1680_v61, %v1463_v55  ;;  %v3161_v22 = vadd.f32 %v1680_v61, %v1453_v53  ;;  %v3165_v23 = vadd.f32 %v1680_v61, %v1468_v39  ;;  %v3167_v8 = vadd.f32 %v1680_v61, %v1478_v27  ;;  %s1669_s29 = sshll.u32 %s2270_s3, 4  ;;  %s1670_s29 = int_to_ptr.vmem [resolvable:$true] %s1669_s29 }
 0x164   :  { %3478 = vst [vmem:[#allocation15_spill] sm:$0xff] %v3146_v3  ;;  %3481 = vst [vmem:[#allocation19_spill] sm:$0xff] %v3152_v14  ;;  %v1513_v14 = vpop.permute.xlu0 %1512  ;;  %v3171_v45 = vadd.f32 %v1680_v61, %v1473_v19  ;;  %v3173_v32 = vadd.f32 %v1680_v61, %v1488_v33  ;;  %v3175_v55 = vadd.f32 %v1680_v61, %v1483_v15  ;;  %s2247_s30 = scalar_lea.vmem %s1670_s29, 2048  ;;  %p2252_p1 = scmp.lt.s32.totalorder %s1670_s29, %s1670_s29 }
 0x165   :  { %v3150_v35 = vpop.f32.mrf.mxu1  ;;  %3483 = vst [vmem:[#allocation23_spill] sm:$0xff] %v3159_v10  ;;  %v3177_v53 = vadd.f32 %v1680_v61, %v1498_v21  ;;  %v737_v37 = vadd.f32 %v2019_v16, %v542_v24  ;;  %v3181_v39 = vadd.f32 %v1680_v61, %v1493_v38  ;;  %v554_v27 = vadd.f32 %v3048_v26, %v3038_v25  ;;  %p2248_p0 = scmp.ne.s32.totalorder %s1670_s29, %s2247_s30  ;;  %p2253_p2 = scmp.lt.s32.totalorder %s2247_s30, %s2247_s30 }
 0x166   :  { %3480 = vst [vmem:[#allocation17_spill] sm:$0xff] %v3150_v35  ;;  %v1537_v35 = vadd.f32 %v1680_v61, %v1458_v18  ;;  %v3183_v18 = vadd.f32 %v1680_v61, %v1508_v9  ;;  %v548_v19 = vadd.f32 %v3052_v49, %v3042_v44  ;;  %v566_v33 = vadd.f32 %v3056_v2, %v3046_v54  ;;  %v1528_v25 = vpop.permute.xlu1 %1527 }
 0x167   :  { %v3154_v46 = vpop.f32.mrf.mxu1  ;;  %v3191_v21 = vadd.f32 %v1680_v61, %v1503_v13  ;;  %v578_v48 = vadd.f32 %v3064_v40, %v3054_v60  ;;  %v730_v16 = vadd.f32 %v3096_v36, %v536_v0  ;;  %v932_v9 = vadd.f32 %v3102_v1, %v737_v37  ;;  %v3489_v37 = vld [vmem:[#allocation27_spill] sm:$0xff]  ;;  %p2254_p3 = por %p2253_p2, %p2252_p1 }
 0x168   :  { %3482 = vst [vmem:[#allocation21_spill] sm:$0xff] %v3154_v46  ;;  %v572_v44 = vadd.f32 %v3068_v47, %v3058_v4  ;;  %v590_v54 = vadd.f32 %v3072_v58, %v3062_v41  ;;  %v584_v26 = vadd.f32 %v3076_v6, %v3066_v52  ;;  %v3207_v42 = vadd.f32 %v1680_v61, %v1518_v51  ;;  %v1523_v47 = vpop.permute.xlu0 %1522 }
 0x169   :  { %v3169_v46 = vpop.f32.mrf.mxu1  ;;  %v602_v60 = vadd.f32 %v3080_v63, %v3070_v57  ;;  %v596_v30 = vadd.f32 %v3084_v12, %v3074_v28  ;;  %v924_v40 = vadd.f32 %v3106_v59, %v730_v16  ;;  %v614_v41 = vadd.f32 %v3088_v11, %v3078_v20  ;;  %p2255_p4 = pnand %p2254_p3, %p2248_p0 }
 0x16a   :  { %v751_v52 = vadd.f32 %v3100_v56, %v554_v27  ;;  %v3217_v58 = vadd.f32 %v1680_v61, %v1513_v14  ;;  %v3219_v1 = vadd.f32 %v1680_v61, %v1528_v25  ;;  %v608_v57 = vadd.f32 %v3092_v29, %v3082_v31  ;;  %v3485_v29 = vld [vmem:[#allocation22_spill] sm:$0xff]  ;;  %v3486_v14 = vld [vmem:[#allocation5_spill] sm:$0xff]  ;;  %v3491_v25 = vld [vmem:[#allocation28_spill] sm:$0xff] }
 0x16b   :  { %v3205_v49 = vpop.f32.mrf.mxu1  ;;  %v744_v28 = vadd.f32 %v3104_v7, %v548_v19  ;;  %v626_v59 = vadd.f32 %v3094_v50, %v3086_v34  ;;  %v3230_v20 = vadd.f32 %v3098_v43, %v3090_v17  ;;  %v3233_v56 = vadd.f32 %v1680_v61, %v1523_v47  ;;  %v3487_v50 = vld [vmem:[#allocation24_spill] sm:$0xff]  ;;  %v3488_v17 = vld [vmem:[#allocation6_spill] sm:$0xff] }
 0x16c   :  { %v948_v11 = vadd.f32 %v3110_v62, %v751_v52  ;;  %v758_v34 = vadd.f32 %v3486_v14, %v560_v5  ;;  %v779_v51 = vadd.f32 %v3487_v50, %v578_v48  ;;  %v772_v43 = vadd.f32 %v3488_v17, %v572_v44  ;;  %v3497_v14 = vld [vmem:[#allocation29_spill] sm:$0xff] }
 0x16d   :  { %v940_v7 = vadd.f32 %v3485_v29, %v744_v28  ;;  %v793_v27 = vadd.f32 %v3489_v37, %v590_v54  ;;  %v3498_v50 = vld [vmem:[#allocation13_spill] sm:$0xff] }
 0x16e   :  { %v821_v17 = vadd.f32 %v3498_v50, %v614_v41 }
 0x185   :  { %v2131_v3 = vpop.f32.mrf.mxu0 }
 0x186   :  { %v1169_v4 = vadd.f32 %v2131_v3, %v932_v9  ;;  %v3484_v3 = vld [vmem:[#allocation18_spill] sm:$0xff]  ;;  %v3490_v9 = vld [vmem:[#allocation20_spill] sm:$0xff] }
 0x187   :  { %v1162_v10 = vpop.f32.mrf.mxu0  ;;  %v765_v31 = vadd.f32 %v3484_v3, %v566_v33 }
 0x188   :  { %v1163_v63 = vadd.f32 %v1162_v10, %v924_v40  ;;  %v786_v40 = vadd.f32 %v3491_v25, %v584_v26  ;;  %v3501_v25 = vld [vmem:[#allocation11_spill] sm:$0xff] }
 0x189   :  { %v2134_v15 = vpop.f32.mrf.mxu0 }
 0x18a   :  { %v1181_v0 = vadd.f32 %v2134_v15, %v948_v11  ;;  %v3493_v15 = vld [vmem:[#allocation8_spill] sm:$0xff]  ;;  %v3495_v11 = vld [vmem:[#allocation10_spill] sm:$0xff] }
 0x18b   :  { %v1174_v2 = vpop.f32.mrf.mxu0  ;;  %v807_v52 = vadd.f32 %v3493_v15, %v602_v60  ;;  %v3502_v15 = vld [vmem:[#allocation16_spill] sm:$0xff] }
 0x18c   :  { %v1175_v19 = vadd.f32 %v1174_v2, %v940_v7  ;;  %v3494_v2 = vld [vmem:[#allocation7_spill] sm:$0xff] }
 0x18d   :  { %v2137_v6 = vpop.f32.mrf.mxu0  ;;  %v2187_v36 = vpop.f32.mrf.mxu1 }
 0x18e   :  { %v3224_v12 = vadd.f32 %v2187_v36, %v1169_v4  ;;  %v3492_v4 = vld [vmem:[#allocation25_spill] sm:$0xff] }
 0x18f   :  { %v1186_v38 = vpop.f32.mrf.mxu0  ;;  %v1339_v13 = vpop.f32.mrf.mxu1  ;;  %v956_v5 = vadd.f32 %v3492_v4, %v758_v34  ;;  %v972_v34 = vadd.f32 %v3497_v14, %v772_v43  ;;  %v988_v4 = vadd.f32 %v3501_v25, %v786_v40  ;;  %v3504_v40 = vld [vmem:[#allocation19_spill] sm:$0xff] }
 0x190   :  { %v1553_v10 = vadd.f32 %v1537_v35, %v3224_v12  ;;  %v3238_v24 = vadd.f32 %v1339_v13, %v1163_v63  ;;  %v964_v35 = vadd.f32 %v3490_v9, %v765_v31  ;;  %v980_v63 = vadd.f32 %v3494_v2, %v779_v51 }
 0x191   :  { %v2140_v62 = vpop.f32.mrf.mxu0  ;;  %v2190_v61 = vpop.f32.mrf.mxu1  ;;  %v1187_v29 = vadd.f32 %v1186_v38, %v956_v5  ;;  %v3500_v38 = vld [vmem:[#allocation12_spill] sm:$0xff] }
 0x192   :  { %v1569_v16 = vmin.f32 %v1553_v10, 0.0  ;;  %v1552_v33 = vadd.f32 %v3161_v22, %v3238_v24  ;;  %v3249_v47 = vadd.f32 %v2190_v61, %v1181_v0  ;;  %v800_v22 = vadd.f32 %v3495_v11, %v596_v30  ;;  %v3496_v10 = vld [vmem:[#allocation23_spill] sm:$0xff]  ;;  %v3499_v61 = vld [vmem:[#allocation9_spill] sm:$0xff] }
 0x193   :  { %v1198_v48 = vpop.f32.mrf.mxu0  ;;  %v1351_v44 = vpop.f32.mrf.mxu1  ;;  %v1193_v13 = vadd.f32 %v2137_v6, %v964_v35  ;;  %v996_v37 = vadd.f32 %v3499_v61, %v793_v27  ;;  %v3507_v61 = vld [vmem:[#allocation21_spill] sm:$0xff] }
 0x194   :  { %v1586_v36 = vmul.f32 1.442695, %v1569_v16  ;;  %v1568_v28 = vmin.f32 %v1552_v33, 0.0  ;;  %v3252_v54 = vadd.f32 %v1351_v44, %v1175_v19  ;;  %v1555_v26 = vadd.f32 %v3165_v23, %v3249_v47 }
 0x195   :  { %v2143_v3 = vpop.f32.mrf.mxu0  ;;  %v2193_v31 = vpop.f32.mrf.mxu1  ;;  %v814_v16 = vadd.f32 %v3500_v38, %v608_v57  ;;  %v1205_v33 = vadd.f32 %v2140_v62, %v980_v63  ;;  %v1199_v5 = vadd.f32 %v1198_v48, %v972_v34  ;;  %v3503_v63 = vld [vmem:[#allocation14_spill] sm:$0xff]  ;;  %v828_v48 = vadd.f32 %v3504_v40, %v3230_v20  ;;  %v3506_v34 = vld [vmem:[#allocation17_spill] sm:$0xff] }
 0x196   :  { %2215 = vpow2.f32 %v1586_v36  ;;  %v1584_v7 = vmul.f32 1.442695, %v1568_v28  ;;  %v1554_v60 = vadd.f32 %v3496_v10, %v3252_v54  ;;  %v1571_v0 = vmin.f32 %v1555_v26, 0.0 }
 0x197   :  { %v3262_v51 = vadd.f32 %v2193_v31, %v1193_v13  ;;  %v1210_v30 = vpop.f32.mrf.mxu0  ;;  %v1363_v6 = vpop.f32.mrf.mxu1  ;;  %v835_v36 = vadd.f32 %v3502_v15, %v626_v59  ;;  %v1012_v11 = vadd.f32 %v3503_v63, %v807_v52  ;;  %v1217_v26 = vadd.f32 %v2143_v3, %v996_v37 }
 0x198   :  { %2217 = vpow2.f32 %v1584_v7  ;;  %v1570_v23 = vmin.f32 %v1554_v60, 0.0  ;;  %v3265_v19 = vadd.f32 %v1363_v6, %v1187_v29  ;;  %v1590_v9 = vmul.f32 1.442695, %v1571_v0  ;;  %v3505_v7 = vld [vmem:[#allocation15_spill] sm:$0xff] }
 0x199   :  { %v1557_v43 = vadd.f32 %v3167_v8, %v3262_v51  ;;  %v2146_v35 = vpop.f32.mrf.mxu0  ;;  %v2196_v41 = vpop.f32.mrf.mxu1  ;;  %v1004_v10 = vadd.f32 %v3505_v7, %v800_v22  ;;  %v1211_v60 = vadd.f32 %v1210_v30, %v988_v4  ;;  %v1028_v50 = vadd.f32 %v3506_v34, %v821_v17 }
 0x19a   :  { %v1588_v44 = vmul.f32 1.442695, %v1570_v23  ;;  %v1556_v27 = vadd.f32 %v3171_v45, %v3265_v19  ;;  %2219 = vpow2.f32 %v1590_v9  ;;  %v3274_v2 = vadd.f32 %v2196_v41, %v1205_v33 }
 0x19b   :  { %v1573_v28 = vmin.f32 %v1557_v43, 0.0  ;;  %v1222_v57 = vpop.f32.mrf.mxu0  ;;  %v1375_v62 = vpop.f32.mrf.mxu1  ;;  %v1020_v37 = vadd.f32 %v3507_v61, %v814_v16  ;;  %v1044_v22 = vadd.f32 %v3169_v46, %v835_v36  ;;  %v1229_v30 = vadd.f32 %v2146_v35, %v1012_v11 }
 0x19c   :  { %2221 = vpow2.f32 %v1588_v44  ;;  %v1572_v8 = vmin.f32 %v1556_v27, 0.0  ;;  %v3277_v13 = vadd.f32 %v1375_v62, %v1199_v5  ;;  %v1559_v45 = vadd.f32 %v3173_v32, %v3274_v2 }
 0x19d   :  { %v1594_v31 = vmul.f32 1.442695, %v1573_v28  ;;  %v2149_v59 = vpop.f32.mrf.mxu0  ;;  %v2199_v29 = vpop.f32.mrf.mxu1  ;;  %v1617_v33 = vmul.f32 0.5, %v3224_v12  ;;  %v1616_v9 = vmul.f32 0.5, %v3238_v24  ;;  %v1223_v25 = vadd.f32 %v1222_v57, %v1004_v10 }
 0x19e   :  { %v1592_v14 = vmul.f32 1.442695, %v1572_v8  ;;  %v1558_v52 = vadd.f32 %v3175_v55, %v3277_v13  ;;  %v1575_v0 = vmin.f32 %v1559_v45, 0.0  ;;  %v3287_v6 = vadd.f32 %v2199_v29, %v1217_v26 }
 0x19f   :  { %2223 = vpow2.f32 %v1594_v31  ;;  %v1234_v20 = vpop.f32.mrf.mxu0  ;;  %v1387_v3 = vpop.f32.mrf.mxu1  ;;  %v1036_v12 = vadd.f32 %v3205_v49, %v828_v48  ;;  %v1619_v8 = vmul.f32 0.5, %v3249_v47  ;;  %v1620_v61 = vmul.f32 0.5, %v3265_v19 }
 0x1a0   :  { %2225 = vpow2.f32 %v1592_v14  ;;  %v1574_v32 = vmin.f32 %v1558_v52, 0.0  ;;  %v3290_v23 = vadd.f32 %v1387_v3, %v1211_v60  ;;  %v1598_v38 = vmul.f32 1.442695, %v1575_v0 }
 0x1a1   :  { %v1561_v55 = vadd.f32 %v3177_v53, %v3287_v6  ;;  %v2202_v17 = vpop.f32.mrf.mxu1  ;;  %v2152_v5 = vpop.f32.mrf.mxu0  ;;  %v1241_v53 = vadd.f32 %v2149_v59, %v1028_v50  ;;  %v1235_v62 = vadd.f32 %v1234_v20, %v1020_v37  ;;  %v1622_v19 = vmul.f32 0.5, %v3277_v13 }
 0x1a2   :  { %v1596_v43 = vmul.f32 1.442695, %v1574_v32  ;;  %v1560_v16 = vadd.f32 %v3181_v39, %v3290_v23  ;;  %2227 = vpow2.f32 %v1598_v38  ;;  %v3299_v46 = vadd.f32 %v2202_v17, %v1229_v30 }
 0x1a3   :  { %v2216_v41 = vpop.eup %2215  ;;  %v1577_v4 = vmin.f32 %v1561_v55, 0.0  ;;  %v1399_v35 = vpop.f32.mrf.mxu1  ;;  %v1253_v47 = vadd.f32 %v2152_v5, %v1044_v22 }
 0x1a4   :  { %v1633_v44 = vadd.f32 %v2216_v41, %v1617_v33  ;;  %2229 = vpow2.f32 %v1596_v43  ;;  %v1576_v27 = vmin.f32 %v1560_v16, 0.0  ;;  %v1563_v36 = vadd.f32 %v3183_v18, %v3299_v46  ;;  %v1246_v26 = vpop.f32.mrf.mxu0 }
 0x1a5   :  { %v2218_v15 = vpop.eup %2217  ;;  %v1602_v24 = vmul.f32 1.442695, %v1577_v4  ;;  %v3304_v39 = vadd.f32 %v1399_v35, %v1223_v25  ;;  %v2205_v28 = vpop.f32.mrf.mxu1  ;;  %v1618_v18 = vmul.f32 0.5, %v3252_v54  ;;  %v1247_v34 = vadd.f32 %v1246_v26, %v1036_v12 }
 0x1a6   :  { %1649 = vst [vmem:[#allocation2 + $0x8] sm:$0xff] %v1633_v44  ;;  %v1632_v57 = vadd.f32 %v2218_v15, %v1616_v9  ;;  %v1600_v63 = vmul.f32 1.442695, %v1576_v27  ;;  %v3306_v11 = vadd.f32 %v2205_v28, %v1241_v53  ;;  %v1579_v40 = vmin.f32 %v1563_v36, 0.0 }
 0x1a7   :  { %2231 = vpow2.f32 %v1602_v24  ;;  %v1562_v49 = vadd.f32 %v3191_v21, %v3304_v39  ;;  %v1411_v48 = vpop.f32.mrf.mxu1  ;;  %v2220_v31 = vpop.eup %2219  ;;  %v1621_v54 = vmul.f32 0.5, %v3262_v51  ;;  %v1623_v33 = vmul.f32 0.5, %v3274_v2 }
 0x1a8   :  { %1648 = vst [vmem:[#allocation2] sm:$0xff] %v1632_v57  ;;  %2233 = vpow2.f32 %v1600_v63  ;;  %v1565_v45 = vadd.f32 %v3207_v42, %v3306_v11  ;;  %v3314_v59 = vadd.f32 %v1411_v48, %v1235_v62  ;;  %v1635_v7 = vadd.f32 %v2220_v31, %v1619_v8 }
 0x1a9   :  { %v2222_v29 = vpop.eup %2221  ;;  %v1606_v10 = vmul.f32 1.442695, %v1579_v40  ;;  %v1578_v60 = vmin.f32 %v1562_v49, 0.0  ;;  %v2208_v14 = vpop.f32.mrf.mxu1  ;;  %v1625_v35 = vmul.f32 0.5, %v3287_v6  ;;  %v1624_v2 = vmul.f32 0.5, %v3290_v23 }
 0x1aa   :  { %v1634_v52 = vadd.f32 %v2222_v29, %v1618_v18  ;;  %v1581_v21 = vmin.f32 %v1565_v45, 0.0  ;;  %v1564_v50 = vadd.f32 %v3217_v58, %v3314_v59  ;;  %1651 = vst [vmem:[#allocation2 + $0x18] sm:$0xff] %v1635_v7  ;;  %v1430_v42 = vadd.f32 %v2208_v14, %v1253_v47 }
 0x1ab   :  { %2235 = vpow2.f32 %v1606_v10  ;;  %v1604_v0 = vmul.f32 1.442695, %v1578_v60  ;;  %v1423_v20 = vpop.f32.mrf.mxu1  ;;  %v1627_v13 = vmul.f32 0.5, %v3299_v46  ;;  %v1626_v24 = vmul.f32 0.5, %v3304_v39 }
 0x1ac   :  { %v2224_v3 = vpop.eup %2223  ;;  %1650 = vst [vmem:[#allocation2 + $0x10] sm:$0xff] %v1634_v52  ;;  %v1610_v37 = vmul.f32 1.442695, %v1581_v21  ;;  %v1580_v32 = vmin.f32 %v1564_v50, 0.0  ;;  %v1424_v22 = vadd.f32 %v1423_v20, %v1247_v34  ;;  %v1567_v55 = vadd.f32 %v3219_v1, %v1430_v42 }
 0x1ad   :  { %v2226_v30 = vpop.eup %2225  ;;  %v1637_v38 = vadd.f32 %v2224_v3, %v1621_v54  ;;  %2237 = vpow2.f32 %v1604_v0  ;;  %v1629_v6 = vmul.f32 0.5, %v3306_v11  ;;  %v1628_v23 = vmul.f32 0.5, %v3314_v59 }
 0x1ae   :  { %v1636_v58 = vadd.f32 %v2226_v30, %v1620_v61  ;;  %2239 = vpow2.f32 %v1610_v37  ;;  %v1608_v17 = vmul.f32 1.442695, %v1580_v32  ;;  %v1566_v51 = vadd.f32 %v3233_v56, %v1424_v22 }
 0x1af   :  { %1653 = vst [vmem:[#allocation2 + $0x28] sm:$0xff] %v1637_v38  ;;  %v1583_v9 = vmin.f32 %v1567_v55, 0.0  ;;  %v2228_v43 = vpop.eup %2227  ;;  %v1631_v40 = vmul.f32 0.5, %v1430_v42  ;;  %v1630_v26 = vmul.f32 0.5, %v1424_v22 }
 0x1b0   :  { %1652 = vst [vmem:[#allocation2 + $0x20] sm:$0xff] %v1636_v58  ;;  %2241 = vpow2.f32 %v1608_v17  ;;  %v1582_v16 = vmin.f32 %v1566_v51, 0.0  ;;  %v1639_v25 = vadd.f32 %v2228_v43, %v1623_v33 }
 0x1b1   :  { %v2230_v41 = vpop.eup %2229  ;;  %v1614_v4 = vmul.f32 1.442695, %v1583_v9 }
 0x1b2   :  { %v1638_v5 = vadd.f32 %v2230_v41, %v1622_v19  ;;  %v1612_v1 = vmul.f32 1.442695, %v1582_v16  ;;  %1655 = vst [vmem:[#allocation2 + $0x38] sm:$0xff] %v1639_v25 }
 0x1b3   :  { %2243 = vpow2.f32 %v1614_v4 }
 0x1b4   :  { %v2232_v56 = vpop.eup %2231  ;;  %1654 = vst [vmem:[#allocation2 + $0x30] sm:$0xff] %v1638_v5  ;;  %2245 = vpow2.f32 %v1612_v1 }
 0x1b5   :  { %v2234_v44 = vpop.eup %2233  ;;  %v1641_v53 = vadd.f32 %v2232_v56, %v1625_v35 }
 0x1b6   :  { %v1640_v27 = vadd.f32 %v2234_v44, %v1624_v2 }
 0x1b7   :  { %1657 = vst [vmem:[#allocation2 + $0x48] sm:$0xff] %v1641_v53 }
 0x1b8   :  { %v2236_v15 = vpop.eup %2235  ;;  %1656 = vst [vmem:[#allocation2 + $0x40] sm:$0xff] %v1640_v27 }
 0x1b9   :  { %v1643_v12 = vadd.f32 %v2236_v15, %v1627_v13 }
 0x1ba   :  { %v2238_v36 = vpop.eup %2237 }
 0x1bb   :  { %v2240_v28 = vpop.eup %2239  ;;  %1659 = vst [vmem:[#allocation2 + $0x58] sm:$0xff] %v1643_v12  ;;  %v1642_v57 = vadd.f32 %v2238_v36, %v1626_v24 }
 0x1bc   :  { %v1645_v62 = vadd.f32 %v2240_v28, %v1629_v6 }
 0x1bd   :  { %v2242_v63 = vpop.eup %2241  ;;  %1658 = vst [vmem:[#allocation2 + $0x50] sm:$0xff] %v1642_v57 }
 0x1be   :  { %1661 = vst [vmem:[#allocation2 + $0x68] sm:$0xff] %v1645_v62  ;;  %v1644_v8 = vadd.f32 %v2242_v63, %v1628_v23 }
 0x1c0   :  { %v2244_v46 = vpop.eup %2243  ;;  %1660 = vst [vmem:[#allocation2 + $0x60] sm:$0xff] %v1644_v8 }
 0x1c1   :  { %v2246_v39 = vpop.eup %2245  ;;  %v1647_v49 = vadd.f32 %v2244_v46, %v1631_v40 }
 0x1c2   :  { %v1646_v48 = vadd.f32 %v2246_v39, %v1630_v26 }
 0x1c3   :  { %1663 = vst [vmem:[#allocation2 + $0x78] sm:$0xff] %v1647_v49 }
 0x1c4   :  { %1662 = vst [vmem:[#allocation2 + $0x70] sm:$0xff] %v1646_v48 }
 0x1c5   :  { %2258 = shalt.err (!%p2255_p4)
}
 0x1c6   :  { %s2271_s5 = smov 128   ;;  %s2272_s6 = smov 8  }
 0x1c7   :  { %1675 = dma.vmem_to_hbm [thread:$0]  %s1670_s29, 2048, %s3337_s4, [#allocation3], %s2271_s5, %s2271_s5, %s2272_s6  }
 0x1c8   :  { %2267 = dma.done.wait [#allocation3], 2048  }
 0x1c9   :  { %2268 = vsyncadd [#allocation3], 4294965248 }
 0x1ca   :  { %1679 = vsyncpa [#allocation3], 1 }

</bundles_post_ra>
